<compile_context>
chip_gen: v5e
topology: v5e:2x2
jax: 0.10.0
libtpu: 0.0.40
codegen_flags: <defaults>
</compile_context>

<pallas_src>
import numpy as np
import jax
import jax.numpy as jnp
from jax.experimental import pallas as pl
from jax.experimental.pallas import tpu as pltpu


# ---------------- fused forward kernel ----------------

def _net_fused_kernel(x_ref, a1_ref, b1_ref, sc1_ref, sr1_ref,
                      a2_ref, b2_ref, sc2_ref, sr2_ref,
                      wfc1_ref, bfc1_ref, wfc2_ref, bfc2_ref,
                      relu3_ref, logp_ref):
    f32 = jnp.float32
    x = x_ref[0, 0]                                   # (28, 28) one sample

    k = a1_ref.shape[0]                               # 5 (conv kernel size)
    H1 = x.shape[0] - k + 1                           # 24 conv1 output height
    H1p = sr1_ref.shape[1]                            # 12 pooled height
    H2 = H1p - k + 1                                  # 8  conv2 output height
    H2p = sr2_ref.shape[1]                            # 4  pooled height
    Wc = wfc1_ref.shape[0] // H2p                     # 80 fc1-weight rows per spatial row

    # ---- conv1 (1->10, k=5, valid) + bias + ReLU: (24, 24*10) = (ho, wo*10+co)
    y1 = jnp.dot(x[0:H1, :], a1_ref[0], preferred_element_type=f32)
    for kh in range(1, k):
        y1 = y1 + jnp.dot(x[kh:kh + H1, :], a1_ref[kh], preferred_element_type=f32)
    y1 = jnp.maximum(y1 + b1_ref[...], 0.0)

    # ---- pool1 (2x2 max) fused via selection matmuls -> (12, 12*10)
    cp1 = jnp.maximum(jnp.dot(y1, sc1_ref[0], preferred_element_type=f32),
                      jnp.dot(y1, sc1_ref[1], preferred_element_type=f32))
    p1 = jnp.maximum(jnp.dot(sr1_ref[0], cp1, preferred_element_type=f32),
                     jnp.dot(sr1_ref[1], cp1, preferred_element_type=f32))

    # ---- conv2 (10->20, k=5, valid) + bias + ReLU: (8, 8*20) = (ho, wo*20+co)
    y2 = jnp.dot(p1[0:H2, :], a2_ref[0], preferred_element_type=f32)
    for kh in range(1, k):
        y2 = y2 + jnp.dot(p1[kh:kh + H2, :], a2_ref[kh], preferred_element_type=f32)
    y2 = jnp.maximum(y2 + b2_ref[...], 0.0)

    # ---- pool2 (2x2 max) -> (4, 4*20)
    cp2 = jnp.maximum(jnp.dot(y2, sc2_ref[0], preferred_element_type=f32),
                      jnp.dot(y2, sc2_ref[1], preferred_element_type=f32))
    p2 = jnp.maximum(jnp.dot(sr2_ref[0], cp2, preferred_element_type=f32),
                     jnp.dot(sr2_ref[1], cp2, preferred_element_type=f32))

    # ---- fc1 (320 -> 50, output padded to 128 lanes) + ReLU
    # Torch's NCHW-flatten ordering is folded into wfc1 (pre-permuted outside).
    acc = bfc1_ref[...]                               # (1, 128); lanes >= 50 are 0
    for h in range(H2p):
        acc = acc + jnp.dot(p2[h:h + 1, :], wfc1_ref[h * Wc:(h + 1) * Wc, :],
                            preferred_element_type=f32)
    relu3 = jnp.maximum(acc, 0.0)                     # padded lanes stay exactly 0
    relu3_ref[0] = relu3

    # ---- fc2 (50 -> 10, padded to 128 lanes) + numerically stable log-softmax
    # Padded logit lanes carry bias -1e30 so they contribute exp(...)=0 to the sum.
    logits = jnp.dot(relu3, wfc2_ref[...], preferred_element_type=f32) + bfc2_ref[...]
    m = jnp.max(logits, axis=-1, keepdims=True)
    s = logits - m
    lse = jnp.log(jnp.sum(jnp.exp(s), axis=-1, keepdims=True))
    logp_ref[0] = s - lse


# ---------------- one-time weight re-layout (outside the hot path) ----------------

def _conv_band_matrices(w, out_w):
    """w: (Cout, Cin, k, k) torch-layout conv weight.
    Returns A: (k, Win*Cin, Wo*Cout) with
      A[kh, (wo+kw)*Cin + ci, wo*Cout + co] = w[co, ci, kh, kw],
    so that sum_kh  X[kh:kh+Ho, :] @ A[kh]  equals the valid conv in (ho, wo*Cout+co) layout."""
    cout, cin, k, _ = w.shape
    win = out_w + k - 1
    kh, co, ci, kw, wo = np.meshgrid(np.arange(k), np.arange(cout), np.arange(cin),
                                     np.arange(k), np.arange(out_w), indexing="ij")
    rows = (wo + kw) * cin + ci
    cols = wo * cout + co
    vals = w[co, ci, kh, kw]
    A = jnp.zeros((k, win * cin, out_w * cout), jnp.float32)
    return A.at[kh, rows, cols].set(vals)


def _col_pool_selectors(out_w, c):
    """(2, Wo*C, (Wo//2)*C) 0/1 matrices selecting even / odd column groups."""
    S = np.zeros((2, out_w * c, (out_w // 2) * c), np.float32)
    for par in range(2):
        for j in range(out_w // 2):
            for ch in range(c):
                S[par, (2 * j + par) * c + ch, j * c + ch] = 1.0
    return jnp.asarray(S)


def _row_pool_selectors(h):
    """(2, H//2, H) 0/1 matrices selecting even / odd rows."""
    S = np.zeros((2, h // 2, h), np.float32)
    for par in range(2):
        for i in range(h // 2):
            S[par, i, 2 * i + par] = 1.0
    return jnp.asarray(S)


def _fc1_weight_perm(fc1_w, c, h, w, n_pad):
    """fc1_w: (50, 320) with torch input index c*16 + h*4 + w.
    Returns (H*W*C, n_pad) with rows ordered (h, w, c) — matching the kernel's
    pooled-activation layout — and output columns zero-padded to n_pad lanes."""
    n_out = fc1_w.shape[0]
    hh, ww, cc, oo = np.meshgrid(np.arange(h), np.arange(w), np.arange(c),
                                 np.arange(n_out), indexing="ij")
    rows = hh * (w * c) + ww * c + cc
    vals = fc1_w[oo, cc * (h * w) + hh * w + ww]
    Wp = jnp.zeros((h * w * c, n_pad), jnp.float32)
    return Wp.at[rows, oo].set(vals)


def prepare_params(params):
    """Pre-lay-out all weights once: banded conv matrices, pooling selectors,
    permuted/padded fc weights and biases. Call once; reuse for every forward."""
    n_k = params["conv1_w"].shape[0]          # 10
    return {
        "A1": _conv_band_matrices(params["conv1_w"], out_w=24),          # (5, 28, 240)
        "b1": jnp.tile(params["conv1_b"], 24)[None, :].astype(jnp.float32),
        "Sc1": _col_pool_selectors(24, n_k),                              # (2, 240, 120)
        "Sr1": _row_pool_selectors(24),                                   # (2, 12, 24)
        "A2": _conv_band_matrices(params["conv2_w"], out_w=8),            # (5, 120, 160)
        "b2": jnp.tile(params["conv2_b"], 8)[None, :].astype(jnp.float32),
        "Sc2": _col_pool_selectors(8, 20),                                # (2, 160, 80)
        "Sr2": _row_pool_selectors(8),                                    # (2, 4, 8)
        "Wfc1": _fc1_weight_perm(params["fc1_w"], c=20, h=4, w=4, n_pad=128),  # (320, 128)
        "bfc1": jnp.zeros((1, 128), jnp.float32).at[0, :50].set(params["fc1_b"]),
        "Wfc2": jnp.zeros((128, 128), jnp.float32).at[:50, :10].set(params["fc2_w"].T),
        "bfc2": jnp.full((1, 128), -1e30, jnp.float32).at[0, :10].set(params["fc2_b"]),
    }


# ---------------- wrapper ----------------

def net_forward(x, prep):
    """Net.forward with n_active_layers='all': returns (relu3_out, logsoftmax_output)."""
    n = x.shape[0]

    def inv(a):  # grid-invariant whole-array block
        return pl.BlockSpec(a.shape, lambda b: (0,) * a.ndim)

    ordered = [prep[k] for k in ("A1", "b1", "Sc1", "Sr1", "A2", "b2",
                                 "Sc2", "Sr2", "Wfc1", "bfc1", "Wfc2", "bfc2")]

    relu3_pad, logp_pad = pl.pallas_call(
        _net_fused_kernel,
        out_shape=(jax.ShapeDtypeStruct((n, 1, 128), jnp.float32),
                   jax.ShapeDtypeStruct((n, 1, 128), jnp.float32)),
        grid=(n,),
        in_specs=[pl.BlockSpec((1, 1, 28, 28), lambda b: (b, 0, 0, 0))]
                 + [inv(a) for a in ordered],
        out_specs=(pl.BlockSpec((1, 1, 128), lambda b: (b, 0, 0)),
                   pl.BlockSpec((1, 1, 128), lambda b: (b, 0, 0))),
        compiler_params=pltpu.CompilerParams(dimension_semantics=("parallel",)),
    )(x, *ordered)

    return relu3_pad[:, 0, :50], logp_pad[:, 0, :10]


# ---------------- parameter init (matches torch defaults approximately) ----------------

def init_params(key, n_kernels=10):
    ks = jax.random.split(key, 8)

    def u(k, shape, fan_in):
        bound = 1.0 / jnp.sqrt(jnp.float32(fan_in))
        return jax.random.uniform(k, shape, jnp.float32, -bound, bound)

    return {
        "conv1_w": u(ks[0], (n_kernels, 1, 5, 5), 1 * 25),
        "conv1_b": u(ks[1], (n_kernels,), 1 * 25),
        "conv2_w": u(ks[2], (20, n_kernels, 5, 5), n_kernels * 25),
        "conv2_b": u(ks[3], (20,), n_kernels * 25),
        "fc1_w": u(ks[4], (50, 320), 320),
        "fc1_b": u(ks[5], (50,), 320),
        "fc2_w": u(ks[6], (10, 50), 50),
        "fc2_b": u(ks[7], (10,), 50),
    }


# ---------------- plain-XLA reference (for correctness cross-check) ----------------

def net_forward_reference(x, params):
    hi = jax.lax.Precision.HIGHEST
    conv1 = jax.lax.conv_general_dilated(
        x, params["conv1_w"], (1, 1), "VALID",
        dimension_numbers=("NCHW", "OIHW", "NCHW"), precision=hi)
    relu1 = jnp.maximum(conv1 + params["conv1_b"][None, :, None, None], 0.0)
    pool1 = jax.lax.reduce_window(relu1, -jnp.inf, jax.lax.max,
                                  (1, 1, 2, 2), (1, 1, 2, 2), "VALID")
    conv2 = jax.lax.conv_general_dilated(
        pool1, params["conv2_w"], (1, 1), "VALID",
        dimension_numbers=("NCHW", "OIHW", "NCHW"), precision=hi)
    relu2 = jnp.maximum(conv2 + params["conv2_b"][None, :, None, None], 0.0)
    pool2 = jax.lax.reduce_window(relu2, -jnp.inf, jax.lax.max,
                                  (1, 1, 2, 2), (1, 1, 2, 2), "VALID")
    fc1_in = pool2.reshape(pool2.shape[0], -1)
    relu3 = jnp.maximum(jnp.dot(fc1_in, params["fc1_w"].T, precision=hi)
                        + params["fc1_b"], 0.0)
    logits = jnp.dot(relu3, params["fc2_w"].T, precision=hi) + params["fc2_b"]
    return relu3, jax.nn.log_softmax(logits, axis=-1)


if __name__ == "__main__":
    key = jax.random.PRNGKey(0)
    kx, kp = jax.random.split(key)
    # MNIST-like input: fc1(320) requires 28x28 spatial. Small batch = 2.
    x = jax.random.normal(kx, (2, 1, 28, 28), jnp.float32)
    params = init_params(kp)
    prep = prepare_params(params)        # one-time weight re-layout, outside the hot path

    fwd = jax.jit(net_forward)
    relu3, logp = fwd(x, prep)
    jax.block_until_ready((relu3, logp))

    assert relu3.shape == (2, 50) and logp.shape == (2, 10)
    # log-softmax rows must (log-)sum to 1
    assert jnp.allclose(jnp.sum(jnp.exp(logp), axis=-1), 1.0, atol=1e-4)

    # Cross-check the fused kernel against a plain-XLA reference of the same forward.
    ref_relu3, ref_logp = net_forward_reference(x, params)
    assert jnp.allclose(relu3, ref_relu3, atol=2e-2, rtol=2e-2)
    assert jnp.allclose(logp, ref_logp, atol=2e-2, rtol=2e-2)

    print("KERNEL_OK")
</pallas_src>

<mosaic_0001>
module attributes {stable_mosaic.version = 11 : i64} {
  func.func @_net_fused_kernel(%arg0: i32, %arg1: memref<1x1x28x28xf32, #tpu.memory_space<vmem>>, %arg2: memref<5x28x240xf32, #tpu.memory_space<vmem>>, %arg3: memref<1x240xf32, #tpu.memory_space<vmem>>, %arg4: memref<2x240x120xf32, #tpu.memory_space<vmem>>, %arg5: memref<2x12x24xf32, #tpu.memory_space<vmem>>, %arg6: memref<5x120x160xf32, #tpu.memory_space<vmem>>, %arg7: memref<1x160xf32, #tpu.memory_space<vmem>>, %arg8: memref<2x160x80xf32, #tpu.memory_space<vmem>>, %arg9: memref<2x4x8xf32, #tpu.memory_space<vmem>>, %arg10: memref<320x128xf32, #tpu.memory_space<vmem>>, %arg11: memref<1x128xf32, #tpu.memory_space<vmem>>, %arg12: memref<128x128xf32, #tpu.memory_space<vmem>>, %arg13: memref<1x128xf32, #tpu.memory_space<vmem>>, %arg14: memref<1x1x128xf32, #tpu.memory_space<vmem>>, %arg15: memref<1x1x128xf32, #tpu.memory_space<vmem>>) attributes {dimension_semantics = [#tpu.dimension_semantics<parallel>], iteration_bounds = array<i64: 2>, scalar_prefetch = 0 : i64, scratch_operands = 0 : i64, tpu.core_type = #tpu.core_type<tc>, window_params = [{transform_indices = @transform_0, window_bounds = array<i64: 1, 1, 28, 28>}, {pipeline_mode = #tpu.pipeline_mode<synchronous>, transform_indices = @transform_1, window_bounds = array<i64: 5, 28, 240>}, {pipeline_mode = #tpu.pipeline_mode<synchronous>, transform_indices = @transform_2, window_bounds = array<i64: 1, 240>}, {pipeline_mode = #tpu.pipeline_mode<synchronous>, transform_indices = @transform_3, window_bounds = array<i64: 2, 240, 120>}, {pipeline_mode = #tpu.pipeline_mode<synchronous>, transform_indices = @transform_4, window_bounds = array<i64: 2, 12, 24>}, {pipeline_mode = #tpu.pipeline_mode<synchronous>, transform_indices = @transform_5, window_bounds = array<i64: 5, 120, 160>}, {pipeline_mode = #tpu.pipeline_mode<synchronous>, transform_indices = @transform_6, window_bounds = array<i64: 1, 160>}, {pipeline_mode = #tpu.pipeline_mode<synchronous>, transform_indices = @transform_7, window_bounds = array<i64: 2, 160, 80>}, {pipeline_mode = #tpu.pipeline_mode<synchronous>, transform_indices = @transform_8, window_bounds = array<i64: 2, 4, 8>}, {pipeline_mode = #tpu.pipeline_mode<synchronous>, transform_indices = @transform_9, window_bounds = array<i64: 320, 128>}, {pipeline_mode = #tpu.pipeline_mode<synchronous>, transform_indices = @transform_10, window_bounds = array<i64: 1, 128>}, {pipeline_mode = #tpu.pipeline_mode<synchronous>, transform_indices = @transform_11, window_bounds = array<i64: 128, 128>}, {pipeline_mode = #tpu.pipeline_mode<synchronous>, transform_indices = @transform_12, window_bounds = array<i64: 1, 128>}, {transform_indices = @transform_13, window_bounds = array<i64: 1, 1, 128>}, {transform_indices = @transform_14, window_bounds = array<i64: 1, 1, 128>}]} {
    %c0 = arith.constant 0 : index
    %c0_0 = arith.constant 0 : index
    %c0_1 = arith.constant 0 : index
    %c0_2 = arith.constant 0 : index
    %0 = vector.load %arg1[%c0, %c0_0, %c0_1, %c0_2] : memref<1x1x28x28xf32, #tpu.memory_space<vmem>>, vector<1x1x28x28xf32>
    %1 = vector.shape_cast %0 : vector<1x1x28x28xf32> to vector<28x28xf32>
    %2 = vector.extract_strided_slice %1 {offsets = [0, 0], sizes = [24, 28], strides = [1, 1]} : vector<28x28xf32> to vector<24x28xf32>
    %c0_3 = arith.constant 0 : index
    %c0_4 = arith.constant 0 : index
    %c0_5 = arith.constant 0 : index
    %3 = vector.load %arg2[%c0_3, %c0_4, %c0_5] : memref<5x28x240xf32, #tpu.memory_space<vmem>>, vector<1x28x240xf32>
    %4 = vector.shape_cast %3 : vector<1x28x240xf32> to vector<28x240xf32>
    %cst = arith.constant dense<0.000000e+00> : vector<24x240xf32>
    %5 = tpu.matmul %2, %4, %cst {dimension_numbers = #tpu.dot_dimension_numbers<[1], [0], [0], [1], [0, 0, 1, 1], [], []>} : vector<24x28xf32>, vector<28x240xf32>, vector<24x240xf32> -> vector<24x240xf32>
    %6 = vector.extract_strided_slice %1 {offsets = [1, 0], sizes = [24, 28], strides = [1, 1]} : vector<28x28xf32> to vector<24x28xf32>
    %c1 = arith.constant 1 : index
    %c0_6 = arith.constant 0 : index
    %c0_7 = arith.constant 0 : index
    %7 = vector.load %arg2[%c1, %c0_6, %c0_7] : memref<5x28x240xf32, #tpu.memory_space<vmem>>, vector<1x28x240xf32>
    %8 = vector.shape_cast %7 : vector<1x28x240xf32> to vector<28x240xf32>
    %cst_8 = arith.constant dense<0.000000e+00> : vector<24x240xf32>
    %9 = tpu.matmul %6, %8, %cst_8 {dimension_numbers = #tpu.dot_dimension_numbers<[1], [0], [0], [1], [0, 0, 1, 1], [], []>} : vector<24x28xf32>, vector<28x240xf32>, vector<24x240xf32> -> vector<24x240xf32>
    %10 = arith.addf %5, %9 : vector<24x240xf32>
    %11 = vector.extract_strided_slice %1 {offsets = [2, 0], sizes = [24, 28], strides = [1, 1]} : vector<28x28xf32> to vector<24x28xf32>
    %c2 = arith.constant 2 : index
    %c0_9 = arith.constant 0 : index
    %c0_10 = arith.constant 0 : index
    %12 = vector.load %arg2[%c2, %c0_9, %c0_10] : memref<5x28x240xf32, #tpu.memory_space<vmem>>, vector<1x28x240xf32>
    %13 = vector.shape_cast %12 : vector<1x28x240xf32> to vector<28x240xf32>
    %cst_11 = arith.constant dense<0.000000e+00> : vector<24x240xf32>
    %14 = tpu.matmul %11, %13, %cst_11 {dimension_numbers = #tpu.dot_dimension_numbers<[1], [0], [0], [1], [0, 0, 1, 1], [], []>} : vector<24x28xf32>, vector<28x240xf32>, vector<24x240xf32> -> vector<24x240xf32>
    %15 = arith.addf %10, %14 : vector<24x240xf32>
    %16 = vector.extract_strided_slice %1 {offsets = [3, 0], sizes = [24, 28], strides = [1, 1]} : vector<28x28xf32> to vector<24x28xf32>
    %c3 = arith.constant 3 : index
    %c0_12 = arith.constant 0 : index
    %c0_13 = arith.constant 0 : index
    %17 = vector.load %arg2[%c3, %c0_12, %c0_13] : memref<5x28x240xf32, #tpu.memory_space<vmem>>, vector<1x28x240xf32>
    %18 = vector.shape_cast %17 : vector<1x28x240xf32> to vector<28x240xf32>
    %cst_14 = arith.constant dense<0.000000e+00> : vector<24x240xf32>
    %19 = tpu.matmul %16, %18, %cst_14 {dimension_numbers = #tpu.dot_dimension_numbers<[1], [0], [0], [1], [0, 0, 1, 1], [], []>} : vector<24x28xf32>, vector<28x240xf32>, vector<24x240xf32> -> vector<24x240xf32>
    %20 = arith.addf %15, %19 : vector<24x240xf32>
    %21 = vector.extract_strided_slice %1 {offsets = [4, 0], sizes = [24, 28], strides = [1, 1]} : vector<28x28xf32> to vector<24x28xf32>
    %c4 = arith.constant 4 : index
    %c0_15 = arith.constant 0 : index
    %c0_16 = arith.constant 0 : index
    %22 = vector.load %arg2[%c4, %c0_15, %c0_16] : memref<5x28x240xf32, #tpu.memory_space<vmem>>, vector<1x28x240xf32>
    %23 = vector.shape_cast %22 : vector<1x28x240xf32> to vector<28x240xf32>
    %cst_17 = arith.constant dense<0.000000e+00> : vector<24x240xf32>
    %24 = tpu.matmul %21, %23, %cst_17 {dimension_numbers = #tpu.dot_dimension_numbers<[1], [0], [0], [1], [0, 0, 1, 1], [], []>} : vector<24x28xf32>, vector<28x240xf32>, vector<24x240xf32> -> vector<24x240xf32>
    %25 = arith.addf %20, %24 : vector<24x240xf32>
    %c0_18 = arith.constant 0 : index
    %c0_19 = arith.constant 0 : index
    %26 = vector.load %arg3[%c0_18, %c0_19] : memref<1x240xf32, #tpu.memory_space<vmem>>, vector<1x240xf32>
    %27 = vector.broadcast %26 : vector<1x240xf32> to vector<24x240xf32>
    %28 = arith.addf %25, %27 : vector<24x240xf32>
    %cst_20 = arith.constant 0.000000e+00 : f32
    %29 = vector.broadcast %cst_20 : f32 to vector<24x240xf32>
    %30 = arith.maximumf %28, %29 : vector<24x240xf32>
    %c0_21 = arith.constant 0 : index
    %c0_22 = arith.constant 0 : index
    %c0_23 = arith.constant 0 : index
    %31 = vector.load %arg4[%c0_21, %c0_22, %c0_23] : memref<2x240x120xf32, #tpu.memory_space<vmem>>, vector<1x240x120xf32>
    %32 = vector.shape_cast %31 : vector<1x240x120xf32> to vector<240x120xf32>
    %cst_24 = arith.constant dense<0.000000e+00> : vector<24x120xf32>
    %33 = tpu.matmul %30, %32, %cst_24 {dimension_numbers = #tpu.dot_dimension_numbers<[1], [0], [0], [1], [0, 0, 1, 1], [], []>} : vector<24x240xf32>, vector<240x120xf32>, vector<24x120xf32> -> vector<24x120xf32>
    %c1_25 = arith.constant 1 : index
    %c0_26 = arith.constant 0 : index
    %c0_27 = arith.constant 0 : index
    %34 = vector.load %arg4[%c1_25, %c0_26, %c0_27] : memref<2x240x120xf32, #tpu.memory_space<vmem>>, vector<1x240x120xf32>
    %35 = vector.shape_cast %34 : vector<1x240x120xf32> to vector<240x120xf32>
    %cst_28 = arith.constant dense<0.000000e+00> : vector<24x120xf32>
    %36 = tpu.matmul %30, %35, %cst_28 {dimension_numbers = #tpu.dot_dimension_numbers<[1], [0], [0], [1], [0, 0, 1, 1], [], []>} : vector<24x240xf32>, vector<240x120xf32>, vector<24x120xf32> -> vector<24x120xf32>
    %37 = arith.maximumf %33, %36 : vector<24x120xf32>
    %c0_29 = arith.constant 0 : index
    %c0_30 = arith.constant 0 : index
    %c0_31 = arith.constant 0 : index
    %38 = vector.load %arg5[%c0_29, %c0_30, %c0_31] : memref<2x12x24xf32, #tpu.memory_space<vmem>>, vector<1x12x24xf32>
    %39 = vector.shape_cast %38 : vector<1x12x24xf32> to vector<12x24xf32>
    %cst_32 = arith.constant dense<0.000000e+00> : vector<12x120xf32>
    %40 = tpu.matmul %39, %37, %cst_32 {dimension_numbers = #tpu.dot_dimension_numbers<[1], [0], [0], [1], [0, 0, 1, 1], [], []>} : vector<12x24xf32>, vector<24x120xf32>, vector<12x120xf32> -> vector<12x120xf32>
    %c1_33 = arith.constant 1 : index
    %c0_34 = arith.constant 0 : index
    %c0_35 = arith.constant 0 : index
    %41 = vector.load %arg5[%c1_33, %c0_34, %c0_35] : memref<2x12x24xf32, #tpu.memory_space<vmem>>, vector<1x12x24xf32>
    %42 = vector.shape_cast %41 : vector<1x12x24xf32> to vector<12x24xf32>
    %cst_36 = arith.constant dense<0.000000e+00> : vector<12x120xf32>
    %43 = tpu.matmul %42, %37, %cst_36 {dimension_numbers = #tpu.dot_dimension_numbers<[1], [0], [0], [1], [0, 0, 1, 1], [], []>} : vector<12x24xf32>, vector<24x120xf32>, vector<12x120xf32> -> vector<12x120xf32>
    %44 = arith.maximumf %40, %43 : vector<12x120xf32>
    %45 = vector.extract_strided_slice %44 {offsets = [0, 0], sizes = [8, 120], strides = [1, 1]} : vector<12x120xf32> to vector<8x120xf32>
    %c0_37 = arith.constant 0 : index
    %c0_38 = arith.constant 0 : index
    %c0_39 = arith.constant 0 : index
    %46 = vector.load %arg6[%c0_37, %c0_38, %c0_39] : memref<5x120x160xf32, #tpu.memory_space<vmem>>, vector<1x120x160xf32>
    %47 = vector.shape_cast %46 : vector<1x120x160xf32> to vector<120x160xf32>
    %cst_40 = arith.constant dense<0.000000e+00> : vector<8x160xf32>
    %48 = tpu.matmul %45, %47, %cst_40 {dimension_numbers = #tpu.dot_dimension_numbers<[1], [0], [0], [1], [0, 0, 1, 1], [], []>} : vector<8x120xf32>, vector<120x160xf32>, vector<8x160xf32> -> vector<8x160xf32>
    %49 = vector.extract_strided_slice %44 {offsets = [1, 0], sizes = [8, 120], strides = [1, 1]} : vector<12x120xf32> to vector<8x120xf32>
    %c1_41 = arith.constant 1 : index
    %c0_42 = arith.constant 0 : index
    %c0_43 = arith.constant 0 : index
    %50 = vector.load %arg6[%c1_41, %c0_42, %c0_43] : memref<5x120x160xf32, #tpu.memory_space<vmem>>, vector<1x120x160xf32>
    %51 = vector.shape_cast %50 : vector<1x120x160xf32> to vector<120x160xf32>
    %cst_44 = arith.constant dense<0.000000e+00> : vector<8x160xf32>
    %52 = tpu.matmul %49, %51, %cst_44 {dimension_numbers = #tpu.dot_dimension_numbers<[1], [0], [0], [1], [0, 0, 1, 1], [], []>} : vector<8x120xf32>, vector<120x160xf32>, vector<8x160xf32> -> vector<8x160xf32>
    %53 = arith.addf %48, %52 : vector<8x160xf32>
    %54 = vector.extract_strided_slice %44 {offsets = [2, 0], sizes = [8, 120], strides = [1, 1]} : vector<12x120xf32> to vector<8x120xf32>
    %c2_45 = arith.constant 2 : index
    %c0_46 = arith.constant 0 : index
    %c0_47 = arith.constant 0 : index
    %55 = vector.load %arg6[%c2_45, %c0_46, %c0_47] : memref<5x120x160xf32, #tpu.memory_space<vmem>>, vector<1x120x160xf32>
    %56 = vector.shape_cast %55 : vector<1x120x160xf32> to vector<120x160xf32>
    %cst_48 = arith.constant dense<0.000000e+00> : vector<8x160xf32>
    %57 = tpu.matmul %54, %56, %cst_48 {dimension_numbers = #tpu.dot_dimension_numbers<[1], [0], [0], [1], [0, 0, 1, 1], [], []>} : vector<8x120xf32>, vector<120x160xf32>, vector<8x160xf32> -> vector<8x160xf32>
    %58 = arith.addf %53, %57 : vector<8x160xf32>
    %59 = vector.extract_strided_slice %44 {offsets = [3, 0], sizes = [8, 120], strides = [1, 1]} : vector<12x120xf32> to vector<8x120xf32>
    %c3_49 = arith.constant 3 : index
    %c0_50 = arith.constant 0 : index
    %c0_51 = arith.constant 0 : index
    %60 = vector.load %arg6[%c3_49, %c0_50, %c0_51] : memref<5x120x160xf32, #tpu.memory_space<vmem>>, vector<1x120x160xf32>
    %61 = vector.shape_cast %60 : vector<1x120x160xf32> to vector<120x160xf32>
    %cst_52 = arith.constant dense<0.000000e+00> : vector<8x160xf32>
    %62 = tpu.matmul %59, %61, %cst_52 {dimension_numbers = #tpu.dot_dimension_numbers<[1], [0], [0], [1], [0, 0, 1, 1], [], []>} : vector<8x120xf32>, vector<120x160xf32>, vector<8x160xf32> -> vector<8x160xf32>
    %63 = arith.addf %58, %62 : vector<8x160xf32>
    %64 = vector.extract_strided_slice %44 {offsets = [4, 0], sizes = [8, 120], strides = [1, 1]} : vector<12x120xf32> to vector<8x120xf32>
    %c4_53 = arith.constant 4 : index
    %c0_54 = arith.constant 0 : index
    %c0_55 = arith.constant 0 : index
    %65 = vector.load %arg6[%c4_53, %c0_54, %c0_55] : memref<5x120x160xf32, #tpu.memory_space<vmem>>, vector<1x120x160xf32>
    %66 = vector.shape_cast %65 : vector<1x120x160xf32> to vector<120x160xf32>
    %cst_56 = arith.constant dense<0.000000e+00> : vector<8x160xf32>
    %67 = tpu.matmul %64, %66, %cst_56 {dimension_numbers = #tpu.dot_dimension_numbers<[1], [0], [0], [1], [0, 0, 1, 1], [], []>} : vector<8x120xf32>, vector<120x160xf32>, vector<8x160xf32> -> vector<8x160xf32>
    %68 = arith.addf %63, %67 : vector<8x160xf32>
    %c0_57 = arith.constant 0 : index
    %c0_58 = arith.constant 0 : index
    %69 = vector.load %arg7[%c0_57, %c0_58] : memref<1x160xf32, #tpu.memory_space<vmem>>, vector<1x160xf32>
    %70 = vector.broadcast %69 : vector<1x160xf32> to vector<8x160xf32>
    %71 = arith.addf %68, %70 : vector<8x160xf32>
    %cst_59 = arith.constant 0.000000e+00 : f32
    %72 = vector.broadcast %cst_59 : f32 to vector<8x160xf32>
    %73 = arith.maximumf %71, %72 : vector<8x160xf32>
    %c0_60 = arith.constant 0 : index
    %c0_61 = arith.constant 0 : index
    %c0_62 = arith.constant 0 : index
    %74 = vector.load %arg8[%c0_60, %c0_61, %c0_62] : memref<2x160x80xf32, #tpu.memory_space<vmem>>, vector<1x160x80xf32>
    %75 = vector.shape_cast %74 : vector<1x160x80xf32> to vector<160x80xf32>
    %cst_63 = arith.constant dense<0.000000e+00> : vector<8x80xf32>
    %76 = tpu.matmul %73, %75, %cst_63 {dimension_numbers = #tpu.dot_dimension_numbers<[1], [0], [0], [1], [0, 0, 1, 1], [], []>} : vector<8x160xf32>, vector<160x80xf32>, vector<8x80xf32> -> vector<8x80xf32>
    %c1_64 = arith.constant 1 : index
    %c0_65 = arith.constant 0 : index
    %c0_66 = arith.constant 0 : index
    %77 = vector.load %arg8[%c1_64, %c0_65, %c0_66] : memref<2x160x80xf32, #tpu.memory_space<vmem>>, vector<1x160x80xf32>
    %78 = vector.shape_cast %77 : vector<1x160x80xf32> to vector<160x80xf32>
    %cst_67 = arith.constant dense<0.000000e+00> : vector<8x80xf32>
    %79 = tpu.matmul %73, %78, %cst_67 {dimension_numbers = #tpu.dot_dimension_numbers<[1], [0], [0], [1], [0, 0, 1, 1], [], []>} : vector<8x160xf32>, vector<160x80xf32>, vector<8x80xf32> -> vector<8x80xf32>
    %80 = arith.maximumf %76, %79 : vector<8x80xf32>
    %c0_68 = arith.constant 0 : index
    %c0_69 = arith.constant 0 : index
    %c0_70 = arith.constant 0 : index
    %81 = vector.load %arg9[%c0_68, %c0_69, %c0_70] : memref<2x4x8xf32, #tpu.memory_space<vmem>>, vector<1x4x8xf32>
    %82 = vector.shape_cast %81 : vector<1x4x8xf32> to vector<4x8xf32>
    %cst_71 = arith.constant dense<0.000000e+00> : vector<4x80xf32>
    %83 = tpu.matmul %82, %80, %cst_71 {dimension_numbers = #tpu.dot_dimension_numbers<[1], [0], [0], [1], [0, 0, 1, 1], [], []>} : vector<4x8xf32>, vector<8x80xf32>, vector<4x80xf32> -> vector<4x80xf32>
    %c1_72 = arith.constant 1 : index
    %c0_73 = arith.constant 0 : index
    %c0_74 = arith.constant 0 : index
    %84 = vector.load %arg9[%c1_72, %c0_73, %c0_74] : memref<2x4x8xf32, #tpu.memory_space<vmem>>, vector<1x4x8xf32>
    %85 = vector.shape_cast %84 : vector<1x4x8xf32> to vector<4x8xf32>
    %cst_75 = arith.constant dense<0.000000e+00> : vector<4x80xf32>
    %86 = tpu.matmul %85, %80, %cst_75 {dimension_numbers = #tpu.dot_dimension_numbers<[1], [0], [0], [1], [0, 0, 1, 1], [], []>} : vector<4x8xf32>, vector<8x80xf32>, vector<4x80xf32> -> vector<4x80xf32>
    %87 = arith.maximumf %83, %86 : vector<4x80xf32>
    %c0_76 = arith.constant 0 : index
    %c0_77 = arith.constant 0 : index
    %88 = vector.load %arg11[%c0_76, %c0_77] : memref<1x128xf32, #tpu.memory_space<vmem>>, vector<1x128xf32>
    %89 = vector.extract_strided_slice %87 {offsets = [0, 0], sizes = [1, 80], strides = [1, 1]} : vector<4x80xf32> to vector<1x80xf32>
    %c0_78 = arith.constant 0 : index
    %c0_79 = arith.constant 0 : index
    %90 = vector.load %arg10[%c0_78, %c0_79] : memref<320x128xf32, #tpu.memory_space<vmem>>, vector<80x128xf32>
    %cst_80 = arith.constant dense<0.000000e+00> : vector<1x128xf32>
    %91 = tpu.matmul %89, %90, %cst_80 {dimension_numbers = #tpu.dot_dimension_numbers<[1], [0], [0], [1], [0, 0, 1, 1], [], []>} : vector<1x80xf32>, vector<80x128xf32>, vector<1x128xf32> -> vector<1x128xf32>
    %92 = arith.addf %88, %91 : vector<1x128xf32>
    %93 = vector.extract_strided_slice %87 {offsets = [1, 0], sizes = [1, 80], strides = [1, 1]} : vector<4x80xf32> to vector<1x80xf32>
    %c80 = arith.constant 80 : index
    %c0_81 = arith.constant 0 : index
    %94 = vector.load %arg10[%c80, %c0_81] : memref<320x128xf32, #tpu.memory_space<vmem>>, vector<80x128xf32>
    %cst_82 = arith.constant dense<0.000000e+00> : vector<1x128xf32>
    %95 = tpu.matmul %93, %94, %cst_82 {dimension_numbers = #tpu.dot_dimension_numbers<[1], [0], [0], [1], [0, 0, 1, 1], [], []>} : vector<1x80xf32>, vector<80x128xf32>, vector<1x128xf32> -> vector<1x128xf32>
    %96 = arith.addf %92, %95 : vector<1x128xf32>
    %97 = vector.extract_strided_slice %87 {offsets = [2, 0], sizes = [1, 80], strides = [1, 1]} : vector<4x80xf32> to vector<1x80xf32>
    %c160 = arith.constant 160 : index
    %c0_83 = arith.constant 0 : index
    %98 = vector.load %arg10[%c160, %c0_83] : memref<320x128xf32, #tpu.memory_space<vmem>>, vector<80x128xf32>
    %cst_84 = arith.constant dense<0.000000e+00> : vector<1x128xf32>
    %99 = tpu.matmul %97, %98, %cst_84 {dimension_numbers = #tpu.dot_dimension_numbers<[1], [0], [0], [1], [0, 0, 1, 1], [], []>} : vector<1x80xf32>, vector<80x128xf32>, vector<1x128xf32> -> vector<1x128xf32>
    %100 = arith.addf %96, %99 : vector<1x128xf32>
    %101 = vector.extract_strided_slice %87 {offsets = [3, 0], sizes = [1, 80], strides = [1, 1]} : vector<4x80xf32> to vector<1x80xf32>
    %c240 = arith.constant 240 : index
    %c0_85 = arith.constant 0 : index
    %102 = vector.load %arg10[%c240, %c0_85] : memref<320x128xf32, #tpu.memory_space<vmem>>, vector<80x128xf32>
    %cst_86 = arith.constant dense<0.000000e+00> : vector<1x128xf32>
    %103 = tpu.matmul %101, %102, %cst_86 {dimension_numbers = #tpu.dot_dimension_numbers<[1], [0], [0], [1], [0, 0, 1, 1], [], []>} : vector<1x80xf32>, vector<80x128xf32>, vector<1x128xf32> -> vector<1x128xf32>
    %104 = arith.addf %100, %103 : vector<1x128xf32>
    %cst_87 = arith.constant 0.000000e+00 : f32
    %105 = vector.broadcast %cst_87 : f32 to vector<1x128xf32>
    %106 = arith.maximumf %104, %105 : vector<1x128xf32>
    %c0_88 = arith.constant 0 : index
    %c0_89 = arith.constant 0 : index
    %c0_90 = arith.constant 0 : index
    %107 = vector.load %arg14[%c0_88, %c0_89, %c0_90] : memref<1x1x128xf32, #tpu.memory_space<vmem>>, vector<1x1x128xf32>
    %108 = vector.shape_cast %107 : vector<1x1x128xf32> to vector<1x128xf32>
    %109 = vector.shape_cast %106 : vector<1x128xf32> to vector<1x1x128xf32>
    tpu.vector_store %arg14[%c0_88, %c0_89, %c0_90], %109 {strides = array<i32>} : memref<1x1x128xf32, #tpu.memory_space<vmem>>, vector<1x1x128xf32>,
    %c0_91 = arith.constant 0 : index
    %c0_92 = arith.constant 0 : index
    %110 = vector.load %arg12[%c0_91, %c0_92] : memref<128x128xf32, #tpu.memory_space<vmem>>, vector<128x128xf32>
    %cst_93 = arith.constant dense<0.000000e+00> : vector<1x128xf32>
    %111 = tpu.matmul %106, %110, %cst_93 {dimension_numbers = #tpu.dot_dimension_numbers<[1], [0], [0], [1], [0, 0, 1, 1], [], []>} : vector<1x128xf32>, vector<128x128xf32>, vector<1x128xf32> -> vector<1x128xf32>
    %c0_94 = arith.constant 0 : index
    %c0_95 = arith.constant 0 : index
    %112 = vector.load %arg13[%c0_94, %c0_95] : memref<1x128xf32, #tpu.memory_space<vmem>>, vector<1x128xf32>
    %113 = arith.addf %111, %112 : vector<1x128xf32>
    %cst_96 = arith.constant dense<0xFF800000> : vector<1xf32>
    %114 = vector.multi_reduction <maximumf>, %113, %cst_96 [1] : vector<1x128xf32> to vector<1xf32>
    %115 = vector.shape_cast %114 : vector<1xf32> to vector<1x1xf32>
    %116 = vector.broadcast %115 : vector<1x1xf32> to vector<1x128xf32>
    %117 = arith.subf %113, %116 : vector<1x128xf32>
    %118 = math.exp %117 : vector<1x128xf32>
    %cst_97 = arith.constant dense<0.000000e+00> : vector<1xf32>
    %119 = vector.multi_reduction <add>, %118, %cst_97 [1] : vector<1x128xf32> to vector<1xf32>
    %120 = vector.shape_cast %119 : vector<1xf32> to vector<1x1xf32>
    %121 = math.log %120 : vector<1x1xf32>
    %122 = vector.broadcast %121 : vector<1x1xf32> to vector<1x128xf32>
    %123 = arith.subf %117, %122 : vector<1x128xf32>
    %c0_98 = arith.constant 0 : index
    %c0_99 = arith.constant 0 : index
    %c0_100 = arith.constant 0 : index
    %124 = vector.load %arg15[%c0_98, %c0_99, %c0_100] : memref<1x1x128xf32, #tpu.memory_space<vmem>>, vector<1x1x128xf32>
    %125 = vector.shape_cast %124 : vector<1x1x128xf32> to vector<1x128xf32>
    %126 = vector.shape_cast %123 : vector<1x128xf32> to vector<1x1x128xf32>
    tpu.vector_store %arg15[%c0_98, %c0_99, %c0_100], %126 {strides = array<i32>} : memref<1x1x128xf32, #tpu.memory_space<vmem>>, vector<1x1x128xf32>,
    return
  }
  func.func @transform_0(%arg0: i32) -> (i32, i32, i32, i32) {
    %c0_i32 = arith.constant 0 : i32
    %c0_i32_0 = arith.constant 0 : i32
    %c0_i32_1 = arith.constant 0 : i32
    %c0_i32_2 = arith.constant 0 : i32
    return %arg0, %c0_i32, %c0_i32_0, %c0_i32_1 : i32, i32, i32, i32
  }
  func.func @transform_1(%arg0: i32) -> (i32, i32, i32) {
    %c0_i32 = arith.constant 0 : i32
    %c0_i32_0 = arith.constant 0 : i32
    %c0_i32_1 = arith.constant 0 : i32
    %c0_i32_2 = arith.constant 0 : i32
    return %c0_i32, %c0_i32_0, %c0_i32_1 : i32, i32, i32
  }
  func.func @transform_2(%arg0: i32) -> (i32, i32) {
    %c0_i32 = arith.constant 0 : i32
    %c0_i32_0 = arith.constant 0 : i32
    %c0_i32_1 = arith.constant 0 : i32
    return %c0_i32, %c0_i32_0 : i32, i32
  }
  func.func @transform_3(%arg0: i32) -> (i32, i32, i32) {
    %c0_i32 = arith.constant 0 : i32
    %c0_i32_0 = arith.constant 0 : i32
    %c0_i32_1 = arith.constant 0 : i32
    %c0_i32_2 = arith.constant 0 : i32
    return %c0_i32, %c0_i32_0, %c0_i32_1 : i32, i32, i32
  }
  func.func @transform_4(%arg0: i32) -> (i32, i32, i32) {
    %c0_i32 = arith.constant 0 : i32
    %c0_i32_0 = arith.constant 0 : i32
    %c0_i32_1 = arith.constant 0 : i32
    %c0_i32_2 = arith.constant 0 : i32
    return %c0_i32, %c0_i32_0, %c0_i32_1 : i32, i32, i32
  }
  func.func @transform_5(%arg0: i32) -> (i32, i32, i32) {
    %c0_i32 = arith.constant 0 : i32
    %c0_i32_0 = arith.constant 0 : i32
    %c0_i32_1 = arith.constant 0 : i32
    %c0_i32_2 = arith.constant 0 : i32
    return %c0_i32, %c0_i32_0, %c0_i32_1 : i32, i32, i32
  }
  func.func @transform_6(%arg0: i32) -> (i32, i32) {
    %c0_i32 = arith.constant 0 : i32
    %c0_i32_0 = arith.constant 0 : i32
    %c0_i32_1 = arith.constant 0 : i32
    return %c0_i32, %c0_i32_0 : i32, i32
  }
  func.func @transform_7(%arg0: i32) -> (i32, i32, i32) {
    %c0_i32 = arith.constant 0 : i32
    %c0_i32_0 = arith.constant 0 : i32
    %c0_i32_1 = arith.constant 0 : i32
    %c0_i32_2 = arith.constant 0 : i32
    return %c0_i32, %c0_i32_0, %c0_i32_1 : i32, i32, i32
  }
  func.func @transform_8(%arg0: i32) -> (i32, i32, i32) {
    %c0_i32 = arith.constant 0 : i32
    %c0_i32_0 = arith.constant 0 : i32
    %c0_i32_1 = arith.constant 0 : i32
    %c0_i32_2 = arith.constant 0 : i32
    return %c0_i32, %c0_i32_0, %c0_i32_1 : i32, i32, i32
  }
  func.func @transform_9(%arg0: i32) -> (i32, i32) {
    %c0_i32 = arith.constant 0 : i32
    %c0_i32_0 = arith.constant 0 : i32
    %c0_i32_1 = arith.constant 0 : i32
    return %c0_i32, %c0_i32_0 : i32, i32
  }
  func.func @transform_10(%arg0: i32) -> (i32, i32) {
    %c0_i32 = arith.constant 0 : i32
    %c0_i32_0 = arith.constant 0 : i32
    %c0_i32_1 = arith.constant 0 : i32
    return %c0_i32, %c0_i32_0 : i32, i32
  }
  func.func @transform_11(%arg0: i32) -> (i32, i32) {
    %c0_i32 = arith.constant 0 : i32
    %c0_i32_0 = arith.constant 0 : i32
    %c0_i32_1 = arith.constant 0 : i32
    return %c0_i32, %c0_i32_0 : i32, i32
  }
  func.func @transform_12(%arg0: i32) -> (i32, i32) {
    %c0_i32 = arith.constant 0 : i32
    %c0_i32_0 = arith.constant 0 : i32
    %c0_i32_1 = arith.constant 0 : i32
    return %c0_i32, %c0_i32_0 : i32, i32
  }
  func.func @transform_13(%arg0: i32) -> (i32, i32, i32) {
    %c0_i32 = arith.constant 0 : i32
    %c0_i32_0 = arith.constant 0 : i32
    %c0_i32_1 = arith.constant 0 : i32
    return %arg0, %c0_i32, %c0_i32_0 : i32, i32, i32
  }
  func.func @transform_14(%arg0: i32) -> (i32, i32, i32) {
    %c0_i32 = arith.constant 0 : i32
    %c0_i32_0 = arith.constant 0 : i32
    %c0_i32_1 = arith.constant 0 : i32
    return %arg0, %c0_i32, %c0_i32_0 : i32, i32, i32
  }
}

</mosaic_0001>

<bundles_post_ra>
// kernel: net_forward.1
= control target key start
LH: loop header
LB: loop body
LE: loop exit
PB: predicated region body
PF: predicated region fallthrough
CT: control target
= control target key end

     0   :  { %s3871_s0 = inlined_call_operand.vmem [shape: f32[2,1,28,28], index: 0, kind: input, shape index: {}]   ;;  %s3872_s1 = inlined_call_operand.vmem [shape: f32[5,28,240], index: 1, kind: input, shape index: {}]   ;;  %s3873_s2 = inlined_call_operand.vmem [shape: f32[1,240], index: 2, kind: input, shape index: {}]   ;;  %s3874_s3 = inlined_call_operand.vmem [shape: f32[2,240,120], index: 3, kind: input, shape index: {}]   ;;  %s3875_s4 = inlined_call_operand.vmem [shape: f32[2,12,24], index: 4, kind: input, shape index: {}]   ;;  %s3876_s5 = inlined_call_operand.vmem [shape: f32[5,120,160], index: 5, kind: input, shape index: {}]   ;;  %s3877_s6 = inlined_call_operand.vmem [shape: f32[1,160], index: 6, kind: input, shape index: {}]   ;;  %s3878_s7 = inlined_call_operand.vmem [shape: f32[2,160,80], index: 7, kind: input, shape index: {}]   ;;  %s3879_s8 = inlined_call_operand.vmem [shape: f32[2,4,8], index: 8, kind: input, shape index: {}]   ;;  %s3880_s9 = inlined_call_operand.vmem [shape: f32[320,128], index: 9, kind: input, shape index: {}]   ;;  %s3881_s10 = inlined_call_operand.vmem [shape: f32[1,128], index: 10, kind: input, shape index: {}]   ;;  %s3882_s11 = inlined_call_operand.vmem [shape: f32[128,128], index: 11, kind: input, shape index: {}]   ;;  %s3883_s12 = inlined_call_operand.vmem [shape: f32[1,128], index: 12, kind: input, shape index: {}]   ;;  %s3884_s13 = inlined_call_operand.hbm [shape: f32[2,1,128], index: 13, kind: output, shape index: {0}]   ;;  %s3885_s14 = inlined_call_operand.hbm [shape: f32[2,1,128], index: 14, kind: output, shape index: {1}]  }
   0x1   :  { %3891 = sst [smem:[#allocation13_spill]] %s3871_s0 }
   0x2   :  { %20 = vsyncpa [#allocation3], 0 }
   0x3   :  { %22 = vsyncpa [#allocation3 + $0x1], 0 }
   0x4   :  { %23 = vsyncpa [#allocation5], 0 }
   0x5   :  { %25 = vsyncpa [#allocation5 + $0x1], 0  ;;  %s2545_s29 = smov 0   ;;  %s2547_s30 = smov 0  }
   0x6   :  { %s2549_s15 = smov 0   ;;  %s2551_s16 = smov 0  }
   0x7 LB: > { %3892 = sst [smem:[#allocation8_spill]] %s2456_s29  ;;  %s2566_s17 = sadd.s32 4294967295, %s2468_s16   ;;  %s2468_s16 = sphi %s2551_s16, %s3902_s16   ;;  %s2464_s15 = sphi %s2549_s15, %s3904_s15   ;;  %s2460_s30 = sphi %s2547_s30, %s3906_s30   ;;  %s2456_s29 = sphi %s2545_s29, %s3905_s29  }
   0x8   : > { %3893 = sst [smem:[#allocation9_spill]] %s2464_s15  ;;  %s2036_s18 = sadd.s32 4294967294, %s2468_s16  }
   0x9   : > { %s2570_s19 = sadd.s32 1, %s2468_s16   ;;  %s316_s20 = sadd.s32 1, %s2464_s15 }
   0xa   : > { %3894 = sst [smem:[#allocation10_spill]] %s2570_s19  ;;  %s313_s21 = ssub.s32 %s2468_s16, %s2570_s19 }
   0xb   : > { %p326_p0 = scmp.ne.s32.totalorder %s2464_s15, %s2460_s30  ;;  %p314_p1 = scmp.eq.s32.totalorder %s313_s21, 0 }
   0xc   : > { %p327_p2 = scmp.eq.s32.totalorder %s2566_s17, 1  ;;  %p332_p3 = scmp.ne.s32.totalorder %s2460_s30, %s2456_s29 }
   0xd   : > { %p333_p4 = scmp.eq.s32.totalorder %s2036_s18, 1  ;;  %p2039_p7 = scmp.ge.s32.totalorder %s2468_s16, 1 }
   0xe   : > { %s2581_s22 = scalar_select %p314_p1, %s2464_s15, %s316_s20  }
   0xf   : > { %p2583_p5 = por %p327_p2, %p326_p0  ;;  %p2587_p6 = por %p333_p4, %p332_p3 }
  0x10   : > { %3895 = sst [smem:[#allocation11_spill]] %s2581_s22  ;;  %p421_p8 = scmp.lt.s32.totalorder %s2468_s16, 3 }
  0x11   : > { %s3897_s24 = scalar_select %p2587_p6, 1, 0 }
  0x12   : > { %p422_p9 = pnand %p2039_p7, %p421_p8 }
  0x13   : > { %3898 = sst [smem:[#allocation12_spill]] %s3897_s24  ;;  %p470_p10 = scmp.lt.s32.totalorder (!%p422_p9), %s2566_s17, 1 }
  0x14   : > { %425 = sbr.rel (%p422_p9) target bundleno = 1502 (0x5de), region = 72  ;;  %s3899_s0 = sld [smem:[#allocation13_spill]] (!%p422_p9) }
  0x15   : > { %s3817_s29 = sand.u32 (!%p422_p9), 1, %s2460_s30   ;;  %s1936_s20 = scalar_lea.hbm (!%p422_p9), %s3884_s13, %s2566_s17 }
  0x16   : > { %s463_s19 = scalar_lea.vmem (!%p422_p9), [#allocation2], %s3817_s29  ;;  %s1940_s21 = sshll.u32 (!%p422_p9), %s1936_s20, 4  ;;  %s1941_s21 = int_to_ptr.hbm [resolvable:$true] %s1940_s21 }
  0x17   : > { %s1938_s22 = sshll.u32 (!%p422_p9), %s463_s19, 4  ;;  %s2388_s26 = sshra.s32 (!%p422_p9), %s1941_s21, 4  ;;  %s1939_s22 = int_to_ptr.vmem [resolvable:$true] %s1938_s22  ;;  %s2389_s26 = int_to_ptr.hbm [resolvable:$true] %s2388_s26 }
  0x18   : > { %s2390_s27 = scalar_lea.hbm (!%p422_p9), %s2389_s26, 1  ;;  %s2394_s28 = scalar_lea.hbm (!%p422_p9), %s3884_s13, 2 }
  0x19   : > { %v2048_v0 = vld [vmem:[%s3872_s1 + $0x70] sm:$0xf]  ;;  %vm515_vm0 = vcmask 1043456   ;;  %v2049_v1 = vld [vmem:[%s3872_s1 + $0x78] sm:$0xf]  ;;  %v2046_v2 = vld [vmem:[%s3872_s1 + $0x60] sm:$0xff]  ;;  %p2391_p11 = scmp.ne.s32.totalorder %s2389_s26, %s2390_s27  ;;  %p2395_p0 = scmp.lt.s32.totalorder %s2389_s26, %s3884_s13 }
  0x1a   : > { %2050 = vmatpush.msk.msra.mxu0 %vm515_vm0, %v2048_v0  ;;  %2318 = vmatpush.msk.msra.mxu2 %vm515_vm0, %v2049_v1  ;;  %v2047_v3 = vld [vmem:[%s3872_s1 + $0x68] sm:$0xff]  ;;  %v2044_v4 = vld [vmem:[%s3872_s1 + $0x50] sm:$0xff]  ;;  %v2615_v5 = vld [vmem:[%s3872_s1 + $0x58] sm:$0xff]  ;;  %s471_s18 = scalar_select %p470_p10, %s2566_s17, 1  ;;  %vm500_vm1 = vcmask 1046528   ;;  %vm508_vm2 = vcmask 228352  }
  0x1b   : > { %2319 = vmatpush.msk.msra.mxu3 %vm515_vm0, %v2049_v1  ;;  %v2042_v6 = vld [vmem:[%s3872_s1 + $0x40] sm:$0xff]  ;;  %v2043_v7 = vld [vmem:[%s3872_s1 + $0x48] sm:$0xff]  ;;  %v485_v8 = vld [vmem:[%s3872_s1 + $0x30] sm:$0xf]  ;;  %vm647_vm3 = vcmask 1045504   ;;  %vm734_vm4 = vcmask 1044480   ;;  %p2392_p12 = pnand %p2391_p11, %p2583_p5  ;;  %p2396_p1 = scmp.lt.s32.totalorder %s2394_s28, %s2390_s27 }
  0x1c   : > { %535 = vmatpush.msra.mxu0 %v2046_v2  ;;  %2320 = vmatpush.msra.mxu2 %v2047_v3  ;;  %s2317_s25 = sshll.u32 %s471_s18, 5  ;;  %v2073_v9 = vld [vmem:[%s3872_s1 + $0xb8] sm:$0xf]  ;;  %v483_v11 = vld [vmem:[%s3872_s1 + $0x20] sm:$0xff]  ;;  %v2071_v12 = vld [vmem:[%s3872_s1 + $0xa8] sm:$0xff]  ;;  %vm946_vm5 = vcmask 916480  }
  0x1d   : > { %2321 = vmatpush.msra.mxu3 %v2047_v3  ;;  %s474_s24 = scalar_lea.vmem %s3899_s0, %s2317_s25  ;;  %v486_v10 = vld [vmem:[%s3872_s1 + $0x38] sm:$0xf]  ;;  %2078 = vmatpush.msk.msra.mxu1 %vm515_vm0, %v2073_v9  ;;  %v481_v21 = vld [vmem:[%s3872_s1 + $0x10] sm:$0xff]  ;;  %v484_v26 = vld [vmem:[%s3872_s1 + $0x28] sm:$0xff]  ;;  %vm1096_vm6 = vcmask 195584   ;;  %vm1226_vm7 = vcmask 982016   ;;  %p2393_p13 = pneg %p2392_p12 }
  0x1e   : > { %536 = vmatpush.msra.mxu0 %v2044_v4  ;;  %2322 = vmatpush.msra.mxu2 %v2615_v5  ;;  %v2645_v13 = vld [vmem:[%s474_s24] sm:$0xff]  ;;  %v2647_v14 = vld [vmem:[%s474_s24 + $0x8] sm:$0xff]  ;;  %v2649_v15 = vld [vmem:[%s474_s24 + $0x10] sm:$0xff]  ;;  %vm1575_vm8 = vcmask 261120   ;;  %vm1682_vm9 = vcmask 64512   ;;  %vm1743_vm10 = vcmask 654336   ;;  %p2397_p2 = por %p2396_p1, %p2395_p0 }
  0x1f   : > { %2323 = vmatpush.msra.mxu3 %v2615_v5  ;;  %v501_v16 = vrot.slane %v2645_v13, 1  ;;  %v502_v17 = vrot.slane %v2647_v14, 1  ;;  %v504_v18 = vrot.slane %v2649_v15, 1  ;;  %v2654_v19 = vld [vmem:[%s474_s24 + $0x18] sm:$0xf]  ;;  %706 = vmatpush.msra.mxu1 %v2071_v12  ;;  %v648_v22 = vrot.slane %v2645_v13, 2 }
  0x20   : > { %537 = vmatpush.msra.mxu0 %v2042_v6  ;;  %2324 = vmatpush.msra.mxu2 %v2043_v7  ;;  %v506_v20 = vrot.slane %v2654_v19, 1  ;;  %v649_v23 = vrot.slane %v2647_v14, 2  ;;  %v2069_v27 = vld [vmem:[%s3872_s1 + $0x98] sm:$0xff]  ;;  %v479_v29 = vld [vmem:[%s3872_s1] sm:$0xff]  ;;  %v2067_v31 = vld [vmem:[%s3872_s1 + $0x88] sm:$0xff]  ;;  %v651_v36 = vrot.slane %v2649_v15, 2  ;;  %p2398_p3 = pnand %p2397_p2, %p2393_p13 }
  0x21   : > { %2325 = vmatpush.msra.mxu3 %v2043_v7  ;;  %v2665_v24 = vsel %vm500_vm1, %v501_v16, %v502_v17  ;;  %v505_v25 = vsel %vm500_vm1, %v502_v17, %v504_v18  ;;  %v482_v30 = vld [vmem:[%s3872_s1 + $0x18] sm:$0xff]  ;;  %707 = vmatpush.msra.mxu1 %v2069_v27  ;;  %v480_v33 = vld [vmem:[%s3872_s1 + $0x8] sm:$0xff]  ;;  %v2088_v34 = vld [vmem:[%s3872_s1 + $0xf0] sm:$0xf]  ;;  %v653_v50 = vrot.slane %v2654_v19, 2  ;;  %v821_v54 = vrot.slane %v2645_v13, 4 }
  0x22   : > { %2058 = vmatpush.msk.msrb.mxu2 %vm515_vm0, %v485_v8  ;;  %2054 = vmatpush.msk.msrb.mxu0 %vm515_vm0, %v2049_v1  ;;  %v507_v28 = vsel %vm500_vm1, %v504_v18, %v506_v20  ;;  %v2690_v32 = vsel %vm647_vm3, %v648_v22, %v649_v23  ;;  %v2089_v35 = vld [vmem:[%s3872_s1 + $0xf8] sm:$0xf]  ;;  %v2072_v37 = vld [vmem:[%s3872_s1 + $0xb0] sm:$0xf]  ;;  %v2086_v38 = vld [vmem:[%s3872_s1 + $0xe0] sm:$0xff]  ;;  %v652_v44 = vsel %vm647_vm3, %v649_v23, %v651_v36  ;;  %v822_v55 = vrot.slane %v2647_v14, 4 }
  0x23   : > { %2062 = vmatpush.msk.msrb.mxu3 %vm515_vm0, %v486_v10  ;;  %2051 = vmatmul.msk.f32.vlgmr.msra.gmra.mxu0 %vm508_vm2, %v2665_v24  ;;  %v2087_v39 = vld [vmem:[%s3872_s1 + $0xe8] sm:$0xff]  ;;  %v2070_v40 = vld [vmem:[%s3872_s1 + $0xa0] sm:$0xff]  ;;  %v2105_v41 = vld [vmem:[%s3872_s1 + $0x138] sm:$0xf]  ;;  %v654_v53 = vsel %vm647_vm3, %v651_v36, %v653_v50  ;;  %v735_v58 = vrot.slane %v2645_v13, 3  ;;  %v736_v59 = vrot.slane %v2647_v14, 3 }
  0x24   : > { %599 = vmatpush.msrb.mxu2 %v483_v11  ;;  %2057 = vmatmul.msk.f32.vlgmr.msra.gmra.mxu3 %vm508_vm2, %v507_v28  ;;  %v2084_v42 = vld [vmem:[%s3872_s1 + $0xd0] sm:$0xff]  ;;  %v2085_v43 = vld [vmem:[%s3872_s1 + $0xd8] sm:$0xff]  ;;  %v2082_v46 = vld [vmem:[%s3872_s1 + $0xc0] sm:$0xff]  ;;  %v823_v60 = vsel %vm515_vm0, %v821_v54, %v822_v55  ;;  %v824_v0 = vrot.slane %v2649_v15, 4  ;;  %v738_v1 = vrot.slane %v2649_v15, 3  ;;  %v826_v4 = vrot.slane %v2654_v19, 4 }
  0x25   : > { %2056 = vmatmul.msk.f32.vlgmr.msra.gmra.mxu2 %vm508_vm2, %v505_v25  ;;  %625 = vmatpush.msrb.mxu3 %v484_v26  ;;  %v2068_v45 = vld [vmem:[%s3872_s1 + $0x90] sm:$0xff]  ;;  %v2083_v47 = vld [vmem:[%s3872_s1 + $0xc8] sm:$0xff]  ;;  %v2066_v48 = vld [vmem:[%s3872_s1 + $0x80] sm:$0xff]  ;;  %v737_v63 = vsel %vm734_vm4, %v735_v58, %v736_v59  ;;  %vm1909_vm11 = vcmask 1040384   ;;  %s1924_s18 = scalar_lea.sflag [#allocation3], %s3817_s29 }
  0x26   : > { %600 = vmatpush.msrb.mxu2 %v481_v21  ;;  %561 = vmatpush.msrb.mxu0 %v2047_v3  ;;  %v2103_v49 = vld [vmem:[%s3872_s1 + $0x128] sm:$0xff]  ;;  %v2101_v51 = vld [vmem:[%s3872_s1 + $0x118] sm:$0xff]  ;;  %v2104_v56 = vld [vmem:[%s3872_s1 + $0x130] sm:$0xf]  ;;  %v825_v2 = vsel %vm515_vm0, %v822_v55, %v824_v0  ;;  %v739_v3 = vsel %vm734_vm4, %v736_v59, %v738_v1  ;;  %v827_v6 = vsel %vm515_vm0, %v824_v0, %v826_v4 }
  0x27   : > { %626 = vmatpush.msrb.mxu3 %v482_v30  ;;  %708 = vmatpush.msra.mxu1 %v2067_v31  ;;  %v2099_v52 = vld [vmem:[%s3872_s1 + $0x108] sm:$0xff]  ;;  %v2102_v57 = vld [vmem:[%s3872_s1 + $0x120] sm:$0xff]  ;;  %v2100_v61 = vld [vmem:[%s3872_s1 + $0x110] sm:$0xff] }
  0x28   : > { %601 = vmatpush.msrb.mxu2 %v479_v29  ;;  %2079 = vmatmul.msk.f32.vlgmr.msra.gmra.mxu1 %vm508_vm2, %v2690_v32  ;;  %v2098_v62 = vld [vmem:[%s3872_s1 + $0x100] sm:$0xff]  ;;  %v945_v8 = vld [vmem:[%s3874_s3 + $0xe8] sm:$0xff]  ;;  %v2146_v9 = vld [vmem:[%s3874_s3 + $0x1d8] sm:$0xff] }
  0x29   : > { %562 = vmatpush.msrb.mxu0 %v2615_v5  ;;  %627 = vmatpush.msrb.mxu3 %v480_v33  ;;  %v740_v5 = vrot.slane %v2654_v19, 3  ;;  %v944_v10 = vld [vmem:[%s3874_s3 + $0xe0] sm:$0xff]  ;;  %v2145_v11 = vld [vmem:[%s3874_s3 + $0x1d0] sm:$0xff]  ;;  %v943_v12 = vld [vmem:[%s3874_s3 + $0xd8] sm:$0xff] }
  0x2a   : > { %2090 = vmatpush.msk.msra.mxu2 %vm515_vm0, %v2088_v34  ;;  %2110 = vmatpush.msk.msrb.mxu1 %vm515_vm0, %v2105_v41  ;;  %v941_v16 = vld [vmem:[%s3874_s3 + $0xc8] sm:$0xff]  ;;  %v2142_v17 = vld [vmem:[%s3874_s3 + $0x1b8] sm:$0xff]  ;;  %v940_v18 = vld [vmem:[%s3874_s3 + $0xc0] sm:$0xff] }
  0x2b   : > { %563 = vmatpush.msrb.mxu0 %v2043_v7  ;;  %2094 = vmatpush.msk.msra.mxu3 %vm515_vm0, %v2089_v35  ;;  %v741_v7 = vsel %vm734_vm4, %v738_v1, %v740_v5  ;;  %v2141_v19 = vld [vmem:[%s3874_s3 + $0x1b0] sm:$0xff]  ;;  %v931_v21 = vld [vmem:[%s3874_s3 + $0x78] sm:$0xff]  ;;  %v2132_v23 = vld [vmem:[%s3874_s3 + $0x168] sm:$0xff] }
  0x2c   : > { %2052 = vmatmul.msk.f32.gmra.mxu0 %vm508_vm2, %v505_v25  ;;  %2063 = vmatmul.msk.f32.vlgmr.msrb.gmra.mxu3 %vm508_vm2, %v2645_v13  ;;  %v939_v22 = vld [vmem:[%s3874_s3 + $0xb8] sm:$0xff]  ;;  %v930_v25 = vld [vmem:[%s3874_s3 + $0x70] sm:$0xff]  ;;  %v2131_v27 = vld [vmem:[%s3874_s3 + $0x160] sm:$0xff] }
  0x2d   : > { %2059 = vmatmul.msk.f32.vlgmr.msrb.gmra.mxu2 %vm508_vm2, %v2645_v13  ;;  %2074 = vmatpush.msk.msra.mxu0 %vm515_vm0, %v2072_v37  ;;  %v2144_v13 = vld [vmem:[%s3874_s3 + $0x1c8] sm:$0xff]  ;;  %v938_v26 = vld [vmem:[%s3874_s3 + $0xb0] sm:$0xff]  ;;  %v2130_v31 = vld [vmem:[%s3874_s3 + $0x158] sm:$0xff] }
  0x2e   : > { %767 = vmatpush.msra.mxu2 %v2086_v38  ;;  %793 = vmatpush.msra.mxu3 %v2087_v39  ;;  %v929_v29 = vld [vmem:[%s3874_s3 + $0x68] sm:$0xff]  ;;  %v928_v34 = vld [vmem:[%s3874_s3 + $0x60] sm:$0xff]  ;;  %v2129_v36 = vld [vmem:[%s3874_s3 + $0x150] sm:$0xff] }
  0x2f   : > { %680 = vmatpush.msra.mxu0 %v2070_v40  ;;  %879 = vmatpush.msrb.mxu1 %v2103_v49  ;;  %v937_v30 = vld [vmem:[%s3874_s3 + $0xa8] sm:$0xff]  ;;  %v936_v35 = vld [vmem:[%s3874_s3 + $0xa0] sm:$0xff]  ;;  %v2137_v38 = vld [vmem:[%s3874_s3 + $0x190] sm:$0xff] }
  0x30   : > { %768 = vmatpush.msra.mxu2 %v2084_v42  ;;  %794 = vmatpush.msra.mxu3 %v2085_v43  ;;  %v927_v41 = vld [vmem:[%s3874_s3 + $0x58] sm:$0xff]  ;;  %v2128_v43 = vld [vmem:[%s3874_s3 + $0x148] sm:$0xff]  ;;  %v932_v54 = vld [vmem:[%s3874_s3 + $0x80] sm:$0xff] }
  0x31   : > { %2080 = vmatmul.msk.f32.gmra.mxu1 %vm508_vm2, %v652_v44  ;;  %681 = vmatpush.msra.mxu0 %v2068_v45  ;;  %v935_v42 = vld [vmem:[%s3874_s3 + $0x98] sm:$0xff]  ;;  %v926_v45 = vld [vmem:[%s3874_s3 + $0x50] sm:$0xff]  ;;  %v925_v49 = vld [vmem:[%s3874_s3 + $0x48] sm:$0xff] }
  0x32   : > { %769 = vmatpush.msra.mxu2 %v2082_v46  ;;  %795 = vmatpush.msra.mxu3 %v2083_v47  ;;  %v934_v46 = vld [vmem:[%s3874_s3 + $0x90] sm:$0xff]  ;;  %v2127_v47 = vld [vmem:[%s3874_s3 + $0x140] sm:$0xff]  ;;  %v933_v50 = vld [vmem:[%s3874_s3 + $0x88] sm:$0xff] }
  0x33   : > { %682 = vmatpush.msra.mxu0 %v2066_v48  ;;  %880 = vmatpush.msrb.mxu1 %v2101_v51  ;;  %v2135_v48 = vld [vmem:[%s3874_s3 + $0x180] sm:$0xff]  ;;  %v2126_v51 = vld [vmem:[%s3874_s3 + $0x138] sm:$0xff]  ;;  %v2125_v55 = vld [vmem:[%s3874_s3 + $0x130] sm:$0xff] }
  0x34   : > { %2053 = vmatmul.msk.f32.gmra.mxu0 %vm508_vm2, %v507_v28  ;;  %2064 = vmatmul.msk.f32.gmra.mxu3 %vm508_vm2, %v2647_v14  ;;  %v2139_v28 = vld [vmem:[%s3874_s3 + $0x1a0] sm:$0xff]  ;;  %v2133_v58 = vld [vmem:[%s3874_s3 + $0x170] sm:$0xff]  ;;  %v921_v1 = vld [vmem:[%s3874_s3 + $0x28] sm:$0xff] }
  0x35   : > { %2060 = vmatmul.msk.f32.gmra.mxu2 %vm508_vm2, %v2647_v14  ;;  %881 = vmatpush.msrb.mxu1 %v2099_v52  ;;  %v942_v14 = vld [vmem:[%s3874_s3 + $0xd0] sm:$0xff]  ;;  %v2134_v52 = vld [vmem:[%s3874_s3 + $0x178] sm:$0xff]  ;;  %v2123_v0 = vld [vmem:[%s3874_s3 + $0x120] sm:$0xff] }
  0x36   : > { %984 = vmatpush.msrb.mxu3 %v945_v8  ;;  %956 = vmatpush.msrb.mxu2 %v931_v21  ;;  %v2121_v4 = vld [vmem:[%s3874_s3 + $0x110] sm:$0xff]  ;;  %v2120_v8 = vld [vmem:[%s3874_s3 + $0x108] sm:$0xff] }
  0x37   : > { %1067 = vmatpush.msra.mxu1 %v2146_v9 }
  0x38   : > { %985 = vmatpush.msrb.mxu3 %v944_v10  ;;  %957 = vmatpush.msrb.mxu2 %v930_v25  ;;  %v918_v10 = vld [vmem:[%s3874_s3 + $0x10] sm:$0xff] }
  0x39   : > { %2081 = vmatmul.msk.f32.gmra.mxu1 %vm508_vm2, %v654_v53 }
  0x3a   : > { %1068 = vmatpush.msra.mxu1 %v2145_v11  ;;  %986 = vmatpush.msrb.mxu3 %v943_v12  ;;  %v2119_v11 = vld [vmem:[%s3874_s3 + $0x100] sm:$0xff] }
  0x3b   : > { %958 = vmatpush.msrb.mxu2 %v929_v29 }
  0x3c   : > { %2055 = vmatmul.msk.f32.vlgmr.msrb.gmra.mxu0 %vm508_vm2, %v2665_v24  ;;  %2065 = vmatmul.msk.f32.gmra.mxu3 %vm508_vm2, %v2649_v15  ;;  %v2140_v24 = vld [vmem:[%s3874_s3 + $0x1a8] sm:$0xff] }
  0x3d   : > { %2061 = vmatmul.msk.f32.gmra.mxu2 %vm508_vm2, %v2649_v15  ;;  %2106 = vmatpush.msk.msrb.mxu0 %vm515_vm0, %v2104_v56  ;;  %v2143_v15 = vld [vmem:[%s3874_s3 + $0x1c0] sm:$0xff] }
  0x3e   : > { %1069 = vmatpush.msra.mxu1 %v2144_v13  ;;  %987 = vmatpush.msrb.mxu3 %v942_v14  ;;  %v917_v13 = vld [vmem:[%s3874_s3 + $0x8] sm:$0xff]  ;;  %v2118_v14 = vld [vmem:[%s3874_s3 + $0xf8] sm:$0xff] }
  0x3f   : > { %853 = vmatpush.msrb.mxu0 %v2102_v57  ;;  %959 = vmatpush.msrb.mxu2 %v928_v34 }
  0x40   : > { %1070 = vmatpush.msra.mxu1 %v2143_v15  ;;  %988 = vmatpush.msrb.mxu3 %v941_v16  ;;  %v916_v15 = vld [vmem:[%s3874_s3] sm:$0xff]  ;;  %v2117_v16 = vld [vmem:[%s3874_s3 + $0xf0] sm:$0xff] }
  0x41   : > { %2111 = vmatmul.msk.f32.vlgmr.msrb.gmra.mxu1 %vm508_vm2, %v823_v60  ;;  %854 = vmatpush.msrb.mxu0 %v2100_v61  ;;  %v2124_v61 = vld [vmem:[%s3874_s3 + $0x128] sm:$0xff] }
  0x42   : > { %1071 = vmatpush.msra.mxu1 %v2142_v17  ;;  %989 = vmatpush.msrb.mxu3 %v940_v18 }
  0x43   : > { %855 = vmatpush.msrb.mxu0 %v2098_v62  ;;  %960 = vmatpush.msrb.mxu2 %v927_v41 }
  0x44   : > { %2075 = vmatmul.msk.f32.vlgmr.msra.gmra.mxu0 %vm508_vm2, %v2690_v32  ;;  %2095 = vmatmul.msk.f32.vlgmr.msra.gmra.mxu3 %vm508_vm2, %v737_v63  ;;  %v2138_v32 = vld [vmem:[%s3874_s3 + $0x198] sm:$0xff] }
  0x45   : > { %2091 = vmatmul.msk.f32.vlgmr.msra.gmra.mxu2 %vm508_vm2, %v737_v63  ;;  %1072 = vmatpush.msra.mxu1 %v2141_v19  ;;  %v922_v63 = vld [vmem:[%s3874_s3 + $0x30] sm:$0xff] }
  0x46   : > { %990 = vmatpush.msrb.mxu3 %v939_v22  ;;  %1039 = vmatpush.msra.mxu0 %v2132_v23  ;;  %v898_v22 = vld [vmem:[%s3873_s2] sm:$0x3] }
  0x47   : > { %1073 = vmatpush.msra.mxu1 %v2140_v24  ;;  %961 = vmatpush.msrb.mxu2 %v926_v45 }
  0x48   : > { %991 = vmatpush.msrb.mxu3 %v938_v26  ;;  %1040 = vmatpush.msra.mxu0 %v2131_v27 }
  0x49   : > { %2112 = vmatmul.msk.f32.gmra.mxu1 %vm508_vm2, %v825_v2  ;;  %962 = vmatpush.msrb.mxu2 %v925_v49 }
  0x4a   : > { %1074 = vmatpush.msra.mxu1 %v2139_v28  ;;  %992 = vmatpush.msrb.mxu3 %v937_v30  ;;  %v901_v28 = vperm.slane %v898_v22, 1 }
  0x4b   : > { %1041 = vmatpush.msra.mxu0 %v2130_v31 }
  0x4c   : > { %2076 = vmatmul.msk.f32.gmra.mxu0 %vm508_vm2, %v652_v44  ;;  %2096 = vmatmul.msk.f32.gmra.mxu3 %vm508_vm2, %v739_v3  ;;  %v2136_v44 = vld [vmem:[%s3874_s3 + $0x188] sm:$0xff] }
  0x4d   : > { %2092 = vmatmul.msk.f32.gmra.mxu2 %vm508_vm2, %v739_v3  ;;  %1075 = vmatpush.msra.mxu1 %v2138_v32  ;;  %v920_v3 = vld [vmem:[%s3874_s3 + $0x20] sm:$0xff] }
  0x4e   : > { %993 = vmatpush.msrb.mxu3 %v936_v35  ;;  %1042 = vmatpush.msra.mxu0 %v2129_v36 }
  0x4f   : > { %1076 = vmatpush.msra.mxu1 %v2137_v38 }
  0x50   : > { %994 = vmatpush.msrb.mxu3 %v935_v42  ;;  %1043 = vmatpush.msra.mxu0 %v2128_v43 }
  0x51   : > { %2113 = vmatmul.msk.f32.gmra.mxu1 %vm508_vm2, %v827_v6 }
  0x52   : > { %1077 = vmatpush.msra.mxu1 %v2136_v44  ;;  %995 = vmatpush.msrb.mxu3 %v934_v46 }
  0x53   : > { %1044 = vmatpush.msra.mxu0 %v2127_v47 }
  0x54   : > { %2077 = vmatmul.msk.f32.gmra.mxu0 %vm508_vm2, %v654_v53  ;;  %2097 = vmatmul.msk.f32.gmra.mxu3 %vm508_vm2, %v741_v7  ;;  %v924_v53 = vld [vmem:[%s3874_s3 + $0x40] sm:$0xff] }
  0x55   : > { %2093 = vmatmul.msk.f32.gmra.mxu2 %vm508_vm2, %v741_v7  ;;  %1078 = vmatpush.msra.mxu1 %v2135_v48  ;;  %v919_v7 = vld [vmem:[%s3874_s3 + $0x18] sm:$0xff] }
  0x56   : > { %996 = vmatpush.msrb.mxu3 %v933_v50  ;;  %1045 = vmatpush.msra.mxu0 %v2126_v51  ;;  %v900_v50 = vperm.slane %v898_v22, 0  ;;  %v2178_v22 = vld [vmem:[%s3876_s5 + $0x1a0] sm:$0xff] }
  0x57   : > { %1079 = vmatpush.msra.mxu1 %v2134_v52  ;;  %963 = vmatpush.msrb.mxu2 %v924_v53 }
  0x58   : > { %997 = vmatpush.msrb.mxu3 %v932_v54  ;;  %1046 = vmatpush.msra.mxu0 %v2125_v55 }
  0x59   : > { %1080 = vmatpush.msra.mxu1 %v2133_v58 }
  0x5a   : > { %1047 = vmatpush.msra.mxu0 %v2124_v61 }
  0x5c   : > { %2107 = vmatmul.msk.f32.vlgmr.msrb.gmra.mxu0 %vm508_vm2, %v823_v60  ;;  %v923_v60 = vld [vmem:[%s3874_s3 + $0x38] sm:$0xff] }
  0x5d   : > { %964 = vmatpush.msrb.mxu2 %v923_v60  ;;  %1048 = vmatpush.msra.mxu0 %v2123_v0 }
  0x5f   : > { %965 = vmatpush.msrb.mxu2 %v922_v63 }
  0x61   : > { %966 = vmatpush.msrb.mxu2 %v921_v1 }
  0x63   : > { %967 = vmatpush.msrb.mxu2 %v920_v3 }
  0x64   : > { %2108 = vmatmul.msk.f32.gmra.mxu0 %vm508_vm2, %v825_v2  ;;  %v2122_v2 = vld [vmem:[%s3874_s3 + $0x118] sm:$0xff] }
  0x65   : > { %1049 = vmatpush.msra.mxu0 %v2122_v2  ;;  %968 = vmatpush.msrb.mxu2 %v919_v7 }
  0x67   : > { %1050 = vmatpush.msra.mxu0 %v2121_v4  ;;  %969 = vmatpush.msrb.mxu2 %v918_v10 }
  0x69   : > { %1051 = vmatpush.msra.mxu0 %v2120_v8  ;;  %970 = vmatpush.msrb.mxu2 %v917_v13 }
  0x6b   : > { %1052 = vmatpush.msra.mxu0 %v2119_v11  ;;  %971 = vmatpush.msrb.mxu2 %v916_v15 }
  0x6c   : > { %2109 = vmatmul.msk.f32.gmra.mxu0 %vm508_vm2, %v827_v6 }
  0x6d   : > { %1053 = vmatpush.msra.mxu0 %v2118_v14  ;;  %v2182_v14 = vld [vmem:[%s3876_s5 + $0x1c0] sm:$0xff] }
  0x6f   : > { %1054 = vmatpush.msra.mxu0 %v2117_v16  ;;  %v2180_v16 = vld [vmem:[%s3876_s5 + $0x1b0] sm:$0xff] }
  0xa0   : > { %v2851_v20 = vpop.f32.mrf.mxu0 }
  0xa5   : > { %v2889_v33 = vpop.f32.mrf.mxu1 }
  0xa7   : > { %v2900_v37 = vpop.f32.mrf.mxu3 }
  0xa8   : > { %v2905_v39 = vpop.f32.mrf.mxu2 }
  0xa9   : > { %v2907_v40 = vpop.f32.mrf.mxu0 }
  0xae   : > { %v713_v57 = vpop.f32.mrf.mxu1 }
  0xaf   : > { %v629_v56 = vpop.f32.mrf.mxu3 }
  0xb0   : > { %v603_v62 = vpop.f32.mrf.mxu2 }
  0xb1   : > { %v2957_v59 = vpop.f32.mrf.mxu0  ;;  %v604_v44 = vadd.f32 %v603_v62, %v2851_v20 }
  0xb6   : > { %v716_v9 = vpop.f32.mrf.mxu1 }
  0xb7   : > { %v632_v5 = vpop.f32.mrf.mxu3 }
  0xb8   : > { %v606_v12 = vpop.f32.mrf.mxu2  ;;  %v633_v29 = vadd.f32 %v632_v5, %v2905_v39 }
  0xb9   : > { %v565_v6 = vpop.f32.mrf.mxu0 }
  0xba   : > { %v630_v19 = vadd.f32 %v629_v56, %v565_v6  ;;  %v722_v34 = vadd.f32 %v713_v57, %v633_v29  ;;  %v607_v56 = vadd.f32 %v606_v12, %v2907_v40  ;;  %v2172_v29 = vld [vmem:[%s3876_s5 + $0x170] sm:$0xff] }
  0xbc   : > { %v720_v24 = vadd.f32 %v2889_v33, %v630_v19  ;;  %v1186_v19 = vld [vmem:[%s3876_s5 + $0xd0] sm:$0xff] }
  0xbe   : > { %v883_v21 = vpop.f32.mrf.mxu1 }
  0xbf   : > { %v635_v17 = vpop.f32.mrf.mxu3 }
  0xc0   : > { %v609_v23 = vpop.f32.mrf.mxu2  ;;  %v636_v42 = vadd.f32 %v635_v17, %v2900_v37  ;;  %v1188_v17 = vld [vmem:[%s3876_s5 + $0xe0] sm:$0xff] }
  0xc1   : > { %v684_v18 = vpop.f32.mrf.mxu0  ;;  %v610_v1 = vadd.f32 %v609_v23, %v2957_v59  ;;  %v2184_v59 = vld [vmem:[%s3876_s5 + $0x1d0] sm:$0xff]  ;;  %1272 = vmatpush.msrb.mxu0 %v1188_v17  ;;  %v1184_v23 = vld [vmem:[%s3876_s5 + $0xc0] sm:$0xff]  ;;  %v2171_v17 = vld [vmem:[%s3876_s5 + $0x168] sm:$0xff] }
  0xc2   : > { %v719_v45 = vadd.f32 %v684_v18, %v604_v44  ;;  %v724_v46 = vadd.f32 %v716_v9, %v636_v42  ;;  %1230 = vmatpush.msrb.mxu1 %v2184_v59  ;;  %v2173_v59 = vld [vmem:[%s3876_s5 + $0x178] sm:$0xff] }
  0xc3   : > { %1273 = vmatpush.msrb.mxu0 %v1186_v19  ;;  %v2214_v19 = vld [vmem:[%s3876_s5 + $0x2a0] sm:$0xff] }
  0xc4   : > { %1231 = vmatpush.msrb.mxu1 %v2182_v14  ;;  %v1177_v14 = vld [vmem:[%s3876_s5 + $0x88] sm:$0xff] }
  0xc5   : > { %1274 = vmatpush.msrb.mxu0 %v1184_v23  ;;  %v1173_v23 = vld [vmem:[%s3876_s5 + $0x68] sm:$0xff] }
  0xc6   : > { %v886_v32 = vpop.f32.mrf.mxu1  ;;  %1232 = vmatpush.msrb.mxu1 %v2180_v16  ;;  %v2250_v16 = vld [vmem:[%s3876_s5 + $0x3b0] sm:$0xff] }
  0xc7   : > { %v797_v25 = vpop.f32.mrf.mxu3 }
  0xc8   : > { %v807_v26 = vadd.f32 %v797_v25, %v720_v24  ;;  %v771_v38 = vpop.f32.mrf.mxu2  ;;  %v2176_v25 = vld [vmem:[%s3876_s5 + $0x190] sm:$0xff]  ;;  %1233 = vmatpush.msrb.mxu1 %v2178_v22  ;;  %v2169_v22 = vld [vmem:[%s3876_s5 + $0x158] sm:$0xff] }
  0xc9   : > { %v687_v27 = vpop.f32.mrf.mxu0  ;;  %v806_v48 = vadd.f32 %v771_v38, %v719_v45 }
  0xca   : > { %v893_v30 = vadd.f32 %v883_v21, %v807_v26  ;;  %v721_v58 = vadd.f32 %v687_v27, %v607_v56  ;;  %v1182_v26 = vld [vmem:[%s3876_s5 + $0xb0] sm:$0xff]  ;;  %v2174_v27 = vld [vmem:[%s3876_s5 + $0x180] sm:$0xff]  ;;  %1234 = vmatpush.msrb.mxu1 %v2176_v25  ;;  %v1189_v56 = vld [vmem:[%s3876_s5 + $0xe8] sm:$0xff] }
  0xcb   : > { %1275 = vmatpush.msrb.mxu0 %v1182_v26  ;;  %v2246_v25 = vld [vmem:[%s3876_s5 + $0x390] sm:$0xff]  ;;  %v2167_v26 = vld [vmem:[%s3876_s5 + $0x148] sm:$0xff] }
  0xcc   : > { %v905_v31 = vadd.f32 %v901_v28, %v893_v30  ;;  %v1178_v30 = vld [vmem:[%s3876_s5 + $0x90] sm:$0xff]  ;;  %1235 = vmatpush.msrb.mxu1 %v2174_v27  ;;  %v1171_v27 = vld [vmem:[%s3876_s5 + $0x58] sm:$0xff] }
  0xce   : > { %v911_v35 = vmax.f32 %v905_v31, 0.0  ;;  %v889_v51 = vpop.f32.mrf.mxu1  ;;  %1236 = vmatpush.msrb.mxu1 %v2172_v29  ;;  %v2244_v29 = vld [vmem:[%s3876_s5 + $0x380] sm:$0xff] }
  0xcf   : > { %v800_v36 = vpop.f32.mrf.mxu3 }
  0xd0   : > { %v809_v41 = vadd.f32 %v800_v36, %v722_v34  ;;  %2114 = vmatmul.msk.f32.vlgmr.msrb.gmra.mxu3 %vm946_vm5, %v911_v35  ;;  %2147 = vmatmul.msk.f32.vlgmr.msra.gmra.mxu1 %vm946_vm5, %v911_v35  ;;  %v774_v55 = vpop.f32.mrf.mxu2  ;;  %v1176_v34 = vld [vmem:[%s3876_s5 + $0x80] sm:$0xff] }
  0xd1   : > { %v690_v33 = vpop.f32.mrf.mxu0  ;;  %v808_v62 = vadd.f32 %v774_v55, %v721_v58  ;;  %v2152_v55 = vld [vmem:[%s3875_s4 + $0x10] sm:$0xff]  ;;  %v2183_v58 = vld [vmem:[%s3876_s5 + $0x1c8] sm:$0xff] }
  0xd2   : > { %v895_v43 = vadd.f32 %v886_v32, %v809_v41  ;;  %v723_v4 = vadd.f32 %v690_v33, %v610_v1  ;;  %v2170_v32 = vld [vmem:[%s3876_s5 + $0x160] sm:$0xff]  ;;  %v2168_v41 = vld [vmem:[%s3876_s5 + $0x150] sm:$0xff] }
  0xd3   : > { %v1174_v33 = vld [vmem:[%s3876_s5 + $0x70] sm:$0xff]  ;;  %1237 = vmatpush.msrb.mxu1 %v2170_v32  ;;  %v2158_v1 = vld [vmem:[%s3876_s5 + $0x100] sm:$0xff] }
  0xd4   : > { %v907_v39 = vadd.f32 %v901_v28, %v895_v43  ;;  %v2208_v32 = vld [vmem:[%s3876_s5 + $0x270] sm:$0xff] }
  0xd5   : > { %1238 = vmatpush.msrb.mxu1 %v2168_v41  ;;  %v2240_v41 = vld [vmem:[%s3876_s5 + $0x360] sm:$0xff] }
  0xd6   : > { %v913_v47 = vmax.f32 %v907_v39, 0.0 }
  0xd7   : > { %v803_v49 = vpop.f32.mrf.mxu3 }
  0xd8   : > { %v811_v52 = vadd.f32 %v803_v49, %v724_v46  ;;  %2115 = vmatmul.msk.f32.gmra.mxu3 %vm946_vm5, %v913_v47  ;;  %2148 = vmatmul.msk.f32.gmra.mxu1 %vm946_vm5, %v913_v47  ;;  %v777_v3 = vpop.f32.mrf.mxu2  ;;  %v2166_v47 = vld [vmem:[%s3876_s5 + $0x140] sm:$0xff] }
  0xd9   : > { %v857_v53 = vpop.f32.mrf.mxu0  ;;  %v810_v5 = vadd.f32 %v777_v3, %v723_v4  ;;  %1239 = vmatpush.msrb.mxu1 %v2166_v47  ;;  %v2179_v3 = vld [vmem:[%s3876_s5 + $0x1a8] sm:$0xff]  ;;  %v1183_v4 = vld [vmem:[%s3876_s5 + $0xb8] sm:$0xff] }
  0xda   : > { %v892_v54 = vadd.f32 %v857_v53, %v806_v48  ;;  %v897_v37 = vadd.f32 %v889_v51, %v811_v52  ;;  %v1172_v48 = vld [vmem:[%s3876_s5 + $0x60] sm:$0xff]  ;;  %v2164_v51 = vld [vmem:[%s3876_s5 + $0x130] sm:$0xff]  ;;  %v2219_v47 = vld [vmem:[%s3876_s5 + $0x2c8] sm:$0xff] }
  0xdb   : > { %v1170_v52 = vld [vmem:[%s3876_s5 + $0x50] sm:$0xff]  ;;  %1240 = vmatpush.msrb.mxu1 %v2164_v51  ;;  %v2215_v51 = vld [vmem:[%s3876_s5 + $0x2a8] sm:$0xff] }
  0xdc   : > { %v904_v20 = vadd.f32 %v900_v50, %v892_v54  ;;  %v909_v57 = vadd.f32 %v901_v28, %v897_v37  ;;  %v1180_v28 = vld [vmem:[%s3876_s5 + $0xa0] sm:$0xff]  ;;  %v2185_v37 = vld [vmem:[%s3876_s5 + $0x1d8] sm:$0xff] }
  0xdd   : > { %1276 = vmatpush.msrb.mxu0 %v1180_v28  ;;  %v1094_v54 = vld [vmem:[%s3875_s4] sm:$0xff] }
  0xde   : > { %v910_v60 = vmax.f32 %v904_v20, 0.0  ;;  %v915_v61 = vmax.f32 %v909_v57, 0.0  ;;  %v2162_v20 = vld [vmem:[%s3876_s5 + $0x120] sm:$0xff] }
  0xdf   : > { %1277 = vmatpush.msrb.mxu0 %v1178_v30  ;;  %v1168_v57 = vld [vmem:[%s3876_s5 + $0x40] sm:$0xff]  ;;  %1241 = vmatpush.msrb.mxu1 %v2162_v20  ;;  %v2165_v30 = vld [vmem:[%s3876_s5 + $0x138] sm:$0xff]  ;;  %v2241_v20 = vld [vmem:[%s3876_s5 + $0x368] sm:$0xff] }
  0xe0   : > { %972 = vmatmul.f32.vlgmr.msrb.gmra.mxu2 %v910_v60  ;;  %1055 = vmatmul.f32.vlgmr.msra.gmra.mxu0 %v910_v60  ;;  %v1187_v60 = vld [vmem:[%s3876_s5 + $0xd8] sm:$0xff]  ;;  %v2210_v28 = vld [vmem:[%s3876_s5 + $0x280] sm:$0xff] }
  0xe1   : > { %2116 = vmatmul.msk.f32.gmra.mxu3 %vm946_vm5, %v915_v61  ;;  %2149 = vmatmul.msk.f32.gmra.mxu1 %vm946_vm5, %v915_v61  ;;  %v860_v63 = vpop.f32.mrf.mxu0  ;;  %v2160_v61 = vld [vmem:[%s3876_s5 + $0x110] sm:$0xff] }
  0xe2   : > { %v894_v0 = vadd.f32 %v860_v63, %v808_v62  ;;  %1278 = vmatpush.msrb.mxu0 %v1176_v34  ;;  %v1166_v62 = vld [vmem:[%s3876_s5 + $0x30] sm:$0xff]  ;;  %v2181_v63 = vld [vmem:[%s3876_s5 + $0x1b8] sm:$0xff]  ;;  %1242 = vmatpush.msrb.mxu1 %v2160_v61 }
  0xe3   : > { %v2242_v34 = vld [vmem:[%s3876_s5 + $0x370] sm:$0xff]  ;;  %v2239_v61 = vld [vmem:[%s3876_s5 + $0x358] sm:$0xff] }
  0xe4   : > { %v906_v2 = vadd.f32 %v900_v50, %v894_v0  ;;  %1279 = vmatpush.msrb.mxu0 %v1174_v33  ;;  %v1185_v0 = vld [vmem:[%s3876_s5 + $0xc8] sm:$0xff]  ;;  %1243 = vmatpush.msrb.mxu1 %v2158_v1  ;;  %v2161_v33 = vld [vmem:[%s3876_s5 + $0x118] sm:$0xff] }
  0xe5   : > { %v2203_v1 = vld [vmem:[%s3876_s5 + $0x248] sm:$0xff] }
  0xe6   : > { %v912_v40 = vmax.f32 %v906_v2, 0.0  ;;  %1280 = vmatpush.msrb.mxu0 %v1172_v48  ;;  %v1164_v2 = vld [vmem:[%s3876_s5 + $0x20] sm:$0xff]  ;;  %v2251_v48 = vld [vmem:[%s3876_s5 + $0x3b8] sm:$0xff] }
  0xe8   : > { %975 = vmatmul.f32.gmra.mxu2 %v912_v40  ;;  %1058 = vmatmul.f32.gmra.mxu0 %v912_v40  ;;  %v1095_v40 = vld [vmem:[%s3875_s4 + $0x8] sm:$0xf] }
  0xe9   : > { %v863_v6 = vpop.f32.mrf.mxu0  ;;  %1281 = vmatpush.msrb.mxu0 %v1170_v52  ;;  %v2247_v52 = vld [vmem:[%s3876_s5 + $0x398] sm:$0xff] }
  0xea   : > { %v896_v7 = vadd.f32 %v863_v6, %v810_v5  ;;  %v2153_v5 = vld [vmem:[%s3875_s4 + $0x18] sm:$0xf] }
  0xeb   : > { %1282 = vmatpush.msrb.mxu0 %v1168_v57  ;;  %v2177_v6 = vld [vmem:[%s3876_s5 + $0x198] sm:$0xff]  ;;  %v2207_v57 = vld [vmem:[%s3876_s5 + $0x268] sm:$0xff] }
  0xec   : > { %v908_v8 = vadd.f32 %v900_v50, %v896_v7  ;;  %v1181_v7 = vld [vmem:[%s3876_s5 + $0xa8] sm:$0xff] }
  0xed   : > { %1283 = vmatpush.msrb.mxu0 %v1166_v62  ;;  %v2236_v62 = vld [vmem:[%s3876_s5 + $0x340] sm:$0xff] }
  0xee   : > { %v914_v9 = vmax.f32 %v908_v8, 0.0  ;;  %v2156_v8 = vld [vmem:[%s3876_s5 + $0xf0] sm:$0xff] }
  0xef   : > { %1284 = vmatpush.msrb.mxu0 %v1164_v2  ;;  %1244 = vmatpush.msrb.mxu1 %v2156_v8  ;;  %v2200_v2 = vld [vmem:[%s3876_s5 + $0x230] sm:$0xff]  ;;  %v2233_v8 = vld [vmem:[%s3876_s5 + $0x328] sm:$0xff] }
  0xf0   : > { %978 = vmatmul.f32.gmra.mxu2 %v914_v9  ;;  %1061 = vmatmul.f32.gmra.mxu0 %v914_v9  ;;  %v1162_v9 = vld [vmem:[%s3876_s5 + $0x10] sm:$0xff] }
  0xf1   : > { %1285 = vmatpush.msrb.mxu0 %v1162_v9  ;;  %v2196_v9 = vld [vmem:[%s3876_s5 + $0x210] sm:$0xff] }
 0x14d   : > { %v1082_v11 = vpop.f32.mrf.mxu1 }
 0x153   : > { %v999_v12 = vpop.f32.mrf.mxu3 }
 0x155   : > { %v1085_v18 = vpop.f32.mrf.mxu1 }
 0x15b   : > { %v1002_v21 = vpop.f32.mrf.mxu3 }
 0x15d   : > { %v1056_v10 = vpop.f32.mrf.mxu0 }
 0x15e   : > { %v1088_v35 = vpop.f32.mrf.mxu1  ;;  %v1083_v49 = vadd.f32 %v1082_v11, %v1056_v10  ;;  %v2175_v10 = vld [vmem:[%s3876_s5 + $0x188] sm:$0xff]  ;;  %v1179_v11 = vld [vmem:[%s3876_s5 + $0x98] sm:$0xff] }
 0x163   : > { %v973_v13 = vpop.f32.mrf.mxu2 }
 0x164   : > { %v1005_v36 = vpop.f32.mrf.mxu3  ;;  %v1000_v39 = vadd.f32 %v999_v12, %v973_v13  ;;  %v2218_v12 = vld [vmem:[%s3876_s5 + $0x2c0] sm:$0xff] }
 0x165   : > { %v1059_v15 = vpop.f32.mrf.mxu0  ;;  %v1160_v13 = vld [vmem:[%s3876_s5] sm:$0xff]  ;;  %1348 = vmatpush.msra.mxu1 %v2218_v12  ;;  %v2231_v12 = vld [vmem:[%s3876_s5 + $0x318] sm:$0xff] }
 0x166   : > { %v1086_v45 = vadd.f32 %v1085_v18, %v1059_v15  ;;  %v1091_v53 = vmax.f32 %v1000_v39, %v1083_v49  ;;  %v2216_v15 = vld [vmem:[%s3876_s5 + $0x2b0] sm:$0xff]  ;;  %v1175_v18 = vld [vmem:[%s3876_s5 + $0x78] sm:$0xff]  ;;  %1286 = vmatpush.msrb.mxu0 %v1160_v13  ;;  %v2228_v13 = vld [vmem:[%s3876_s5 + $0x300] sm:$0xff] }
 0x167   : > { %1349 = vmatpush.msra.mxu1 %v2216_v15  ;;  %v1163_v39 = vld [vmem:[%s3876_s5 + $0x18] sm:$0xff]  ;;  %v2195_v15 = vld [vmem:[%s3876_s5 + $0x208] sm:$0xff] }
 0x168   : > { %1426 = vmatpush.msra.mxu0 %v2250_v16  ;;  %v2217_v49 = vld [vmem:[%s3876_s5 + $0x2b8] sm:$0xff]  ;;  %v2226_v16 = vld [vmem:[%s3876_s5 + $0x2f0] sm:$0xff] }
 0x169   : > { %1350 = vmatpush.msra.mxu1 %v2214_v19  ;;  %v2193_v19 = vld [vmem:[%s3876_s5 + $0x1f8] sm:$0xff] }
 0x16b   : > { %v976_v24 = vpop.f32.mrf.mxu2 }
 0x16c   : > { %v1003_v42 = vadd.f32 %v1002_v21, %v976_v24  ;;  %v2248_v21 = vld [vmem:[%s3876_s5 + $0x3a0] sm:$0xff]  ;;  %v2212_v24 = vld [vmem:[%s3876_s5 + $0x290] sm:$0xff] }
 0x16d   : > { %v1062_v31 = vpop.f32.mrf.mxu0  ;;  %1427 = vmatpush.msra.mxu0 %v2248_v21  ;;  %1351 = vmatpush.msra.mxu1 %v2212_v24  ;;  %v2190_v21 = vld [vmem:[%s3876_s5 + $0x1e0] sm:$0xff]  ;;  %v2225_v24 = vld [vmem:[%s3876_s5 + $0x2e8] sm:$0xff] }
 0x16e   : > { %v1089_v43 = vadd.f32 %v1088_v35, %v1062_v31  ;;  %v1092_v50 = vmax.f32 %v1003_v42, %v1086_v45  ;;  %v1169_v31 = vld [vmem:[%s3876_s5 + $0x48] sm:$0xff]  ;;  %v2157_v45 = vld [vmem:[%s3876_s5 + $0xf8] sm:$0xff] }
 0x16f   : > { %1428 = vmatpush.msra.mxu0 %v2246_v25  ;;  %v2163_v35 = vld [vmem:[%s3876_s5 + $0x128] sm:$0xff]  ;;  %1352 = vmatpush.msra.mxu1 %v2210_v28  ;;  %v2222_v25 = vld [vmem:[%s3876_s5 + $0x2d0] sm:$0xff] }
 0x170   : > { %v1165_v42 = vld [vmem:[%s3876_s5 + $0x28] sm:$0xff] }
 0x171   : > { %1429 = vmatpush.msra.mxu0 %v2244_v29  ;;  %1353 = vmatpush.msra.mxu1 %v2208_v32 }
 0x173   : > { %v979_v38 = vpop.f32.mrf.mxu2  ;;  %1430 = vmatpush.msra.mxu0 %v2242_v34 }
 0x174   : > { %v1006_v44 = vadd.f32 %v1005_v36, %v979_v38  ;;  %v1167_v36 = vld [vmem:[%s3876_s5 + $0x38] sm:$0xff]  ;;  %v2206_v38 = vld [vmem:[%s3876_s5 + $0x260] sm:$0xff] }
 0x175   : > { %1354 = vmatpush.msra.mxu1 %v2206_v38  ;;  %1431 = vmatpush.msra.mxu0 %v2240_v41  ;;  %v2282_v41 = vld [vmem:[%s3876_s5 + $0x4a0] sm:$0xff] }
 0x176   : > { %v1093_v46 = vmax.f32 %v1006_v44, %v1089_v43  ;;  %v2204_v43 = vld [vmem:[%s3876_s5 + $0x250] sm:$0xff]  ;;  %v2159_v44 = vld [vmem:[%s3876_s5 + $0x108] sm:$0xff] }
 0x177   : > { %1355 = vmatpush.msra.mxu1 %v2204_v43 }
 0x178   : > { %1116 = vmatpush.msra.mxu3 %v1093_v46  ;;  %1148 = vmatpush.msra.mxu2 %v1093_v46  ;;  %v1161_v46 = vld [vmem:[%s3876_s5 + $0x8] sm:$0xff] }
 0x17a   : > { %1117 = vmatpush.msra.mxu3 %v1092_v50  ;;  %1149 = vmatpush.msra.mxu2 %v1092_v50  ;;  %v2249_v50 = vld [vmem:[%s3876_s5 + $0x3a8] sm:$0xff] }
 0x17c   : > { %1118 = vmatpush.msra.mxu3 %v1091_v53  ;;  %1150 = vmatpush.msra.mxu2 %v1091_v53  ;;  %v2213_v53 = vld [vmem:[%s3876_s5 + $0x298] sm:$0xff] }
 0x17d   : > { %2150 = vmatmul.msk.f32.vlgmr.msra.gmra.mxu3 %vm1096_vm6, %v1094_v54  ;;  %2154 = vmatmul.msk.f32.vlgmr.msra.gmra.mxu2 %vm1096_vm6, %v2152_v55  ;;  %v2245_v54 = vld [vmem:[%s3876_s5 + $0x388] sm:$0xff] }
 0x17e   : > { %1250 = vmatpush.msrb.mxu3 %v2185_v37  ;;  %1292 = vmatpush.msrb.mxu2 %v1189_v56  ;;  %v2211_v55 = vld [vmem:[%s3876_s5 + $0x288] sm:$0xff]  ;;  %v2243_v37 = vld [vmem:[%s3876_s5 + $0x378] sm:$0xff] }
 0x17f   : > { %v2209_v56 = vld [vmem:[%s3876_s5 + $0x278] sm:$0xff] }
 0x180   : > { %1251 = vmatpush.msrb.mxu3 %v2183_v58  ;;  %1293 = vmatpush.msrb.mxu2 %v1187_v60  ;;  %v2205_v58 = vld [vmem:[%s3876_s5 + $0x258] sm:$0xff]  ;;  %v2238_v60 = vld [vmem:[%s3876_s5 + $0x350] sm:$0xff] }
 0x181   : > { %1432 = vmatpush.msra.mxu0 %v2238_v60  ;;  %v2267_v60 = vld [vmem:[%s3876_s5 + $0x428] sm:$0xff] }
 0x182   : > { %1252 = vmatpush.msrb.mxu3 %v2181_v63  ;;  %1294 = vmatpush.msrb.mxu2 %v1185_v0  ;;  %v2237_v63 = vld [vmem:[%s3876_s5 + $0x348] sm:$0xff]  ;;  %v2202_v0 = vld [vmem:[%s3876_s5 + $0x240] sm:$0xff] }
 0x183   : > { %1433 = vmatpush.msra.mxu0 %v2236_v62  ;;  %1356 = vmatpush.msra.mxu1 %v2202_v0  ;;  %v2265_v62 = vld [vmem:[%s3876_s5 + $0x418] sm:$0xff]  ;;  %v2263_v0 = vld [vmem:[%s3876_s5 + $0x408] sm:$0xff] }
 0x184   : > { %1253 = vmatpush.msrb.mxu3 %v2179_v3  ;;  %1295 = vmatpush.msrb.mxu2 %v1183_v4  ;;  %v2201_v3 = vld [vmem:[%s3876_s5 + $0x238] sm:$0xff]  ;;  %v2198_v4 = vld [vmem:[%s3876_s5 + $0x220] sm:$0xff] }
 0x185   : > { %2151 = vmatmul.msk.f32.gmra.mxu3 %vm1096_vm6, %v1095_v40  ;;  %2155 = vmatmul.msk.f32.gmra.mxu2 %vm1096_vm6, %v2153_v5  ;;  %v2199_v40 = vld [vmem:[%s3876_s5 + $0x228] sm:$0xff]  ;;  %v2234_v5 = vld [vmem:[%s3876_s5 + $0x330] sm:$0xff] }
 0x186   : > { %1254 = vmatpush.msrb.mxu3 %v2177_v6  ;;  %1296 = vmatpush.msrb.mxu2 %v1181_v7  ;;  %v2235_v6 = vld [vmem:[%s3876_s5 + $0x338] sm:$0xff]  ;;  %v2232_v7 = vld [vmem:[%s3876_s5 + $0x320] sm:$0xff] }
 0x187   : > { %1357 = vmatpush.msra.mxu1 %v2200_v2  ;;  %1434 = vmatpush.msra.mxu0 %v2234_v5  ;;  %v2261_v2 = vld [vmem:[%s3876_s5 + $0x3f8] sm:$0xff] }
 0x188   : > { %1255 = vmatpush.msrb.mxu3 %v2175_v10  ;;  %1297 = vmatpush.msrb.mxu2 %v1179_v11  ;;  %v2197_v10 = vld [vmem:[%s3876_s5 + $0x218] sm:$0xff]  ;;  %v2230_v11 = vld [vmem:[%s3876_s5 + $0x310] sm:$0xff] }
 0x189   : > { %1358 = vmatpush.msra.mxu1 %v2198_v4  ;;  %1435 = vmatpush.msra.mxu0 %v2232_v7  ;;  %v2259_v4 = vld [vmem:[%s3876_s5 + $0x3e8] sm:$0xff]  ;;  %v2257_v5 = vld [vmem:[%s3876_s5 + $0x3d8] sm:$0xff]  ;;  %v2254_v7 = vld [vmem:[%s3876_s5 + $0x3c0] sm:$0xff] }
 0x18a   : > { %1256 = vmatpush.msrb.mxu3 %v2173_v59  ;;  %1298 = vmatpush.msrb.mxu2 %v1177_v14  ;;  %v2229_v59 = vld [vmem:[%s3876_s5 + $0x308] sm:$0xff]  ;;  %v2194_v14 = vld [vmem:[%s3876_s5 + $0x200] sm:$0xff] }
 0x18b   : > { %1359 = vmatpush.msra.mxu1 %v2196_v9  ;;  %1436 = vmatpush.msra.mxu0 %v2230_v11  ;;  %v1570_v11 = vld [vmem:[%s3878_s7 + $0x78] sm:$0xff] }
 0x18c   : > { %1257 = vmatpush.msrb.mxu3 %v2171_v17  ;;  %1299 = vmatpush.msrb.mxu2 %v1175_v18  ;;  %v2227_v17 = vld [vmem:[%s3876_s5 + $0x2f8] sm:$0xff]  ;;  %v2192_v18 = vld [vmem:[%s3876_s5 + $0x1f0] sm:$0xff] }
 0x18d   : > { %1360 = vmatpush.msra.mxu1 %v2194_v14  ;;  %1437 = vmatpush.msra.mxu0 %v2228_v13  ;;  %v1568_v13 = vld [vmem:[%s3878_s7 + $0x68] sm:$0xff]  ;;  %v1574_v14 = vld [vmem:[%s3878_s7 + $0x98] sm:$0xff] }
 0x18e   : > { %1258 = vmatpush.msrb.mxu3 %v2169_v22  ;;  %1300 = vmatpush.msrb.mxu2 %v1173_v23  ;;  %v2191_v22 = vld [vmem:[%s3876_s5 + $0x1e8] sm:$0xff]  ;;  %v2224_v23 = vld [vmem:[%s3876_s5 + $0x2e0] sm:$0xff] }
 0x18f   : > { %1361 = vmatpush.msra.mxu1 %v2192_v18  ;;  %1438 = vmatpush.msra.mxu0 %v2226_v16  ;;  %v1573_v16 = vld [vmem:[%s3878_s7 + $0x90] sm:$0xff]  ;;  %v1572_v18 = vld [vmem:[%s3878_s7 + $0x88] sm:$0xff] }
 0x190   : > { %1259 = vmatpush.msrb.mxu3 %v2167_v26  ;;  %1301 = vmatpush.msrb.mxu2 %v1171_v27  ;;  %v2223_v26 = vld [vmem:[%s3876_s5 + $0x2d8] sm:$0xff] }
 0x191   : > { %1362 = vmatpush.msra.mxu1 %v2190_v21  ;;  %1439 = vmatpush.msra.mxu0 %v2224_v23  ;;  %v1571_v21 = vld [vmem:[%s3878_s7 + $0x80] sm:$0xff]  ;;  %v2302_v23 = vld [vmem:[%s3878_s7 + $0x118] sm:$0xff] }
 0x192   : > { %1260 = vmatpush.msrb.mxu3 %v2165_v30  ;;  %1302 = vmatpush.msrb.mxu2 %v1169_v31 }
 0x193   : > { %1440 = vmatpush.msra.mxu0 %v2222_v25  ;;  %v2301_v25 = vld [vmem:[%s3878_s7 + $0x110] sm:$0xff] }
 0x194   : > { %1261 = vmatpush.msrb.mxu3 %v2163_v35  ;;  %1303 = vmatpush.msrb.mxu2 %v1167_v36 }
 0x196   : > { %1262 = vmatpush.msrb.mxu3 %v2161_v33  ;;  %1304 = vmatpush.msrb.mxu2 %v1165_v42  ;;  %v2283_v33 = vld [vmem:[%s3876_s5 + $0x4a8] sm:$0xff] }
 0x198   : > { %1263 = vmatpush.msrb.mxu3 %v2159_v44  ;;  %1305 = vmatpush.msrb.mxu2 %v1163_v39  ;;  %v2280_v44 = vld [vmem:[%s3876_s5 + $0x490] sm:$0xff]  ;;  %v2281_v39 = vld [vmem:[%s3876_s5 + $0x498] sm:$0xff] }
 0x19a   : > { %1264 = vmatpush.msrb.mxu3 %v2157_v45  ;;  %1306 = vmatpush.msrb.mxu2 %v1161_v46  ;;  %v2278_v45 = vld [vmem:[%s3876_s5 + $0x480] sm:$0xff]  ;;  %v2279_v46 = vld [vmem:[%s3876_s5 + $0x488] sm:$0xff] }
 0x19c   : > { %1368 = vmatpush.msra.mxu3 %v2219_v47  ;;  %1446 = vmatpush.msra.mxu2 %v2251_v48  ;;  %v2276_v48 = vld [vmem:[%s3876_s5 + $0x470] sm:$0xff] }
 0x19e   : > { %1369 = vmatpush.msra.mxu3 %v2217_v49  ;;  %1447 = vmatpush.msra.mxu2 %v2249_v50  ;;  %v2277_v49 = vld [vmem:[%s3876_s5 + $0x478] sm:$0xff] }
 0x1a0   : > { %1370 = vmatpush.msra.mxu3 %v2215_v51  ;;  %1448 = vmatpush.msra.mxu2 %v2247_v52  ;;  %v2274_v51 = vld [vmem:[%s3876_s5 + $0x460] sm:$0xff]  ;;  %v2275_v52 = vld [vmem:[%s3876_s5 + $0x468] sm:$0xff] }
 0x1a2   : > { %1371 = vmatpush.msra.mxu3 %v2213_v53  ;;  %1449 = vmatpush.msra.mxu2 %v2245_v54  ;;  %v2272_v54 = vld [vmem:[%s3876_s5 + $0x450] sm:$0xff] }
 0x1a4   : > { %1372 = vmatpush.msra.mxu3 %v2211_v55  ;;  %1450 = vmatpush.msra.mxu2 %v2243_v37  ;;  %v2273_v55 = vld [vmem:[%s3876_s5 + $0x458] sm:$0xff]  ;;  %v2270_v37 = vld [vmem:[%s3876_s5 + $0x440] sm:$0xff] }
 0x1a6   : > { %1373 = vmatpush.msra.mxu3 %v2209_v56  ;;  %1451 = vmatpush.msra.mxu2 %v2241_v20  ;;  %v2271_v56 = vld [vmem:[%s3876_s5 + $0x448] sm:$0xff]  ;;  %v2268_v20 = vld [vmem:[%s3876_s5 + $0x430] sm:$0xff] }
 0x1a8   : > { %1374 = vmatpush.msra.mxu3 %v2207_v57  ;;  %1452 = vmatpush.msra.mxu2 %v2239_v61  ;;  %v2269_v57 = vld [vmem:[%s3876_s5 + $0x438] sm:$0xff]  ;;  %v2264_v61 = vld [vmem:[%s3876_s5 + $0x410] sm:$0xff] }
 0x1aa   : > { %1375 = vmatpush.msra.mxu3 %v2205_v58  ;;  %1453 = vmatpush.msra.mxu2 %v2237_v63  ;;  %v2266_v58 = vld [vmem:[%s3876_s5 + $0x420] sm:$0xff] }
 0x1ab   : > { %v2262_v63 = vld [vmem:[%s3876_s5 + $0x400] sm:$0xff] }
 0x1ac   : > { %1376 = vmatpush.msra.mxu3 %v2203_v1  ;;  %1454 = vmatpush.msra.mxu2 %v2235_v6  ;;  %v2260_v1 = vld [vmem:[%s3876_s5 + $0x3f0] sm:$0xff] }
 0x1ae   : > { %1377 = vmatpush.msra.mxu3 %v2201_v3  ;;  %1455 = vmatpush.msra.mxu2 %v2233_v8  ;;  %v2258_v3 = vld [vmem:[%s3876_s5 + $0x3e0] sm:$0xff]  ;;  %v2255_v8 = vld [vmem:[%s3876_s5 + $0x3c8] sm:$0xff] }
 0x1b0   : > { %1378 = vmatpush.msra.mxu3 %v2199_v40  ;;  %1456 = vmatpush.msra.mxu2 %v2231_v12  ;;  %v2256_v40 = vld [vmem:[%s3876_s5 + $0x3d0] sm:$0xff] }
 0x1b1   : > { %v1569_v12 = vld [vmem:[%s3878_s7 + $0x70] sm:$0xff] }
 0x1b2   : > { %1379 = vmatpush.msra.mxu3 %v2197_v10  ;;  %1457 = vmatpush.msra.mxu2 %v2229_v59  ;;  %v1567_v59 = vld [vmem:[%s3878_s7 + $0x60] sm:$0xff] }
 0x1b4   : > { %1380 = vmatpush.msra.mxu3 %v2195_v15  ;;  %1458 = vmatpush.msra.mxu2 %v2227_v17  ;;  %v1566_v15 = vld [vmem:[%s3878_s7 + $0x58] sm:$0xff]  ;;  %v1565_v17 = vld [vmem:[%s3878_s7 + $0x50] sm:$0xff] }
 0x1b6   : > { %1381 = vmatpush.msra.mxu3 %v2193_v19  ;;  %1459 = vmatpush.msra.mxu2 %v2225_v24  ;;  %v1564_v19 = vld [vmem:[%s3878_s7 + $0x48] sm:$0xff]  ;;  %v1562_v24 = vld [vmem:[%s3878_s7 + $0x38] sm:$0xff] }
 0x1b8   : > { %1382 = vmatpush.msra.mxu3 %v2191_v22  ;;  %1460 = vmatpush.msra.mxu2 %v2223_v26  ;;  %v1563_v22 = vld [vmem:[%s3878_s7 + $0x40] sm:$0xff]  ;;  %v1561_v26 = vld [vmem:[%s3878_s7 + $0x30] sm:$0xff] }
 0x200   : > { %v1120_v27 = vpop.f32.mrf.mxu3  ;;  %v1152_v28 = vpop.f32.mrf.mxu2 }
 0x201   : > { %v3398_v29 = vmax.f32 %v1120_v27, %v1152_v28  ;;  %v2300_v27 = vld [vmem:[%s3878_s7 + $0x108] sm:$0xff] }
 0x202   : > { %v1560_v28 = vld [vmem:[%s3878_s7 + $0x28] sm:$0xff] }
 0x203   : > { %2188 = vmatmul.msk.f32.vlgmr.msrb.gmra.mxu0 %vm1226_vm7, %v3398_v29  ;;  %2189 = vmatmul.msk.f32.vlgmr.msrb.gmra.mxu2 %vm1226_vm7, %v3398_v29  ;;  %v1223_v36 = vrot.slane %v3398_v29, 1  ;;  %v1420_v38 = vrot.slane %v3398_v29, 3  ;;  %v1342_v50 = vrot.slane %v3398_v29, 2  ;;  %v1498_v9 = vrot.slane %v3398_v29, 4  ;;  %v2299_v29 = vld [vmem:[%s3878_s7 + $0x100] sm:$0xff] }
 0x204   : > { %1579 = vmatpush.msrb.mxu0 %v1570_v11  ;;  %1611 = vmatpush.msrb.mxu2 %v1574_v14  ;;  %v1844_v14 = vld [vmem:[%s3880_s9 + $0x130] sm:$0xff] }
 0x206   : > { %1580 = vmatpush.msrb.mxu0 %v1569_v12  ;;  %1612 = vmatpush.msrb.mxu2 %v1573_v16  ;;  %v1742_v12 = vld [vmem:[%s3880_s9 + $0x48] sm:$0xff] }
 0x207   : > { %v1843_v16 = vld [vmem:[%s3880_s9 + $0x128] sm:$0xff] }
 0x208   : > { %v1123_v30 = vpop.f32.mrf.mxu3  ;;  %v1155_v31 = vpop.f32.mrf.mxu2  ;;  %1581 = vmatpush.msrb.mxu0 %v1568_v13  ;;  %1613 = vmatpush.msrb.mxu2 %v1572_v18  ;;  %v1845_v13 = vld [vmem:[%s3880_s9 + $0x138] sm:$0xff]  ;;  %v1842_v18 = vld [vmem:[%s3880_s9 + $0x120] sm:$0xff] }
 0x209   : > { %v3404_v32 = vmax.f32 %v1123_v30, %v1155_v31  ;;  %v1559_v30 = vld [vmem:[%s3878_s7 + $0x20] sm:$0xff]  ;;  %v2298_v31 = vld [vmem:[%s3878_s7 + $0xf8] sm:$0xff] }
 0x20a   : > { %1582 = vmatpush.msrb.mxu0 %v1567_v59  ;;  %1614 = vmatpush.msrb.mxu2 %v1571_v21  ;;  %v1741_v59 = vld [vmem:[%s3880_s9 + $0x40] sm:$0xff]  ;;  %v1841_v21 = vld [vmem:[%s3880_s9 + $0x118] sm:$0xff] }
 0x20b   : > { %v1224_v34 = vrot.slane %v3404_v32, 1  ;;  %v1421_v35 = vrot.slane %v3404_v32, 3  ;;  %v1343_v47 = vrot.slane %v3404_v32, 2  ;;  %v1499_v6 = vrot.slane %v3404_v32, 4  ;;  %v1558_v32 = vld [vmem:[%s3878_s7 + $0x18] sm:$0xff] }
 0x20c   : > { %1583 = vmatpush.msrb.mxu0 %v1566_v15  ;;  %v1740_v15 = vld [vmem:[%s3880_s9 + $0x38] sm:$0xff] }
 0x20d   : > { %v1225_v42 = vsel %vm500_vm1, %v1223_v36, %v1224_v34  ;;  %v1422_v43 = vsel %vm734_vm4, %v1420_v38, %v1421_v35  ;;  %v1344_v53 = vsel %vm647_vm3, %v1342_v50, %v1343_v47  ;;  %v1500_v10 = vsel %vm515_vm0, %v1498_v9, %v1499_v6  ;;  %v2297_v34 = vld [vmem:[%s3878_s7 + $0xf0] sm:$0xff]  ;;  %v2296_v36 = vld [vmem:[%s3878_s7 + $0xe8] sm:$0xff]  ;;  %v2291_v47 = vld [vmem:[%s3878_s7 + $0xc0] sm:$0xff] }
 0x20e   : > { %2186 = vmatmul.msk.f32.vlgmr.msrb.gmra.mxu1 %vm1226_vm7, %v1225_v42  ;;  %2187 = vmatmul.msk.f32.vlgmr.msrb.gmra.mxu3 %vm1226_vm7, %v1225_v42  ;;  %v1557_v35 = vld [vmem:[%s3878_s7 + $0x10] sm:$0xff]  ;;  %v1556_v38 = vld [vmem:[%s3878_s7 + $0x8] sm:$0xff]  ;;  %v2294_v42 = vld [vmem:[%s3878_s7 + $0xd8] sm:$0xff] }
 0x20f   : > { %1504 = vmatpush.msrb.mxu1 %v2282_v41  ;;  %1524 = vmatpush.msrb.mxu3 %v2283_v33  ;;  %v2295_v41 = vld [vmem:[%s3878_s7 + $0xe0] sm:$0xff] }
 0x210   : > { %2252 = vmatmul.msk.f32.vlgmr.msra.gmra.mxu0 %vm1226_vm7, %v1422_v43  ;;  %2253 = vmatmul.msk.f32.vlgmr.msra.gmra.mxu2 %vm1226_vm7, %v1422_v43  ;;  %v1555_v33 = vld [vmem:[%s3878_s7] sm:$0xff]  ;;  %v2306_v43 = vld [vmem:[%s3878_s7 + $0x138] sm:$0xff] }
 0x211   : > { %1505 = vmatpush.msrb.mxu1 %v2280_v44  ;;  %1525 = vmatpush.msrb.mxu3 %v2281_v39  ;;  %v2293_v44 = vld [vmem:[%s3878_s7 + $0xd0] sm:$0xff] }
 0x212   : > { %1584 = vmatpush.msrb.mxu0 %v1565_v17  ;;  %1640 = vmatpush.msra.mxu2 %v2302_v23  ;;  %v2305_v39 = vld [vmem:[%s3878_s7 + $0x130] sm:$0xff] }
 0x213   : > { %1506 = vmatpush.msrb.mxu1 %v2278_v45  ;;  %1526 = vmatpush.msrb.mxu3 %v2279_v46  ;;  %v2292_v45 = vld [vmem:[%s3878_s7 + $0xc8] sm:$0xff]  ;;  %v1739_v17 = vld [vmem:[%s3880_s9 + $0x30] sm:$0xff] }
 0x214   : > { %1585 = vmatpush.msrb.mxu0 %v1564_v19  ;;  %1641 = vmatpush.msra.mxu2 %v2301_v25  ;;  %v2304_v46 = vld [vmem:[%s3878_s7 + $0x128] sm:$0xff] }
 0x215   : > { %1507 = vmatpush.msrb.mxu1 %v2276_v48  ;;  %1527 = vmatpush.msrb.mxu3 %v2277_v49  ;;  %v2303_v48 = vld [vmem:[%s3878_s7 + $0x120] sm:$0xff]  ;;  %v2290_v49 = vld [vmem:[%s3878_s7 + $0xb8] sm:$0xff]  ;;  %v1738_v19 = vld [vmem:[%s3880_s9 + $0x28] sm:$0xff] }
 0x216   : > { %2220 = vmatmul.msk.f32.vlgmr.msra.gmra.mxu1 %vm1226_vm7, %v1344_v53  ;;  %2221 = vmatmul.msk.f32.vlgmr.msra.gmra.mxu3 %vm1226_vm7, %v1344_v53  ;;  %v2287_v53 = vld [vmem:[%s3878_s7 + $0xa0] sm:$0xff] }
 0x217   : > { %1508 = vmatpush.msrb.mxu1 %v2274_v51  ;;  %1528 = vmatpush.msrb.mxu3 %v2275_v52  ;;  %v2289_v51 = vld [vmem:[%s3878_s7 + $0xb0] sm:$0xff]  ;;  %v2288_v52 = vld [vmem:[%s3878_s7 + $0xa8] sm:$0xff] }
 0x218   : > { %1586 = vmatpush.msrb.mxu0 %v1563_v22  ;;  %1642 = vmatpush.msra.mxu2 %v2300_v27 }
 0x219   : > { %1509 = vmatpush.msrb.mxu1 %v2272_v54  ;;  %1529 = vmatpush.msrb.mxu3 %v2273_v55 }
 0x21a   : > { %1587 = vmatpush.msrb.mxu0 %v1562_v24  ;;  %1643 = vmatpush.msra.mxu2 %v2299_v29  ;;  %v1681_v29 = vld [vmem:[%s3879_s8] sm:$0xf] }
 0x21b   : > { %1510 = vmatpush.msrb.mxu1 %v2270_v37  ;;  %1530 = vmatpush.msrb.mxu3 %v2271_v56 }
 0x21c   : > { %1588 = vmatpush.msrb.mxu0 %v1561_v26  ;;  %1644 = vmatpush.msra.mxu2 %v2298_v31  ;;  %v1777_v31 = vld [vmem:[%s3880_s9 + $0x98] sm:$0xff] }
 0x21d   : > { %1511 = vmatpush.msrb.mxu1 %v2268_v20  ;;  %1531 = vmatpush.msrb.mxu3 %v2269_v57 }
 0x21e   : > { %1589 = vmatpush.msrb.mxu0 %v1560_v28  ;;  %1645 = vmatpush.msra.mxu2 %v2297_v34  ;;  %v1776_v34 = vld [vmem:[%s3880_s9 + $0x90] sm:$0xff] }
 0x21f   : > { %1512 = vmatpush.msrb.mxu1 %v2266_v58  ;;  %1532 = vmatpush.msrb.mxu3 %v2267_v60  ;;  %v1545_v58 = vld [vmem:[%s3877_s6] sm:$0x3] }
 0x220   : > { %1590 = vmatpush.msrb.mxu0 %v1559_v30  ;;  %1646 = vmatpush.msra.mxu2 %v2296_v36  ;;  %v2309_v30 = vld [vmem:[%s3879_s8 + $0x4] sm:$0xf]  ;;  %v1775_v36 = vld [vmem:[%s3880_s9 + $0x88] sm:$0xff] }
 0x221   : > { %1513 = vmatpush.msrb.mxu1 %v2264_v61  ;;  %1533 = vmatpush.msrb.mxu3 %v2265_v62 }
 0x222   : > { %1591 = vmatpush.msrb.mxu0 %v1558_v32  ;;  %1647 = vmatpush.msra.mxu2 %v2295_v41  ;;  %v1811_v32 = vld [vmem:[%s3880_s9 + $0xe8] sm:$0xff]  ;;  %v1774_v41 = vld [vmem:[%s3880_s9 + $0x80] sm:$0xff] }
 0x223   : > { %1514 = vmatpush.msrb.mxu1 %v2262_v63  ;;  %1534 = vmatpush.msrb.mxu3 %v2263_v0  ;;  %v1547_v0 = vperm.slane %v1545_v58, 0 }
 0x224   : > { %1592 = vmatpush.msrb.mxu0 %v1557_v35  ;;  %1648 = vmatpush.msra.mxu2 %v2294_v42  ;;  %v1810_v35 = vld [vmem:[%s3880_s9 + $0xe0] sm:$0xff]  ;;  %v1772_v42 = vld [vmem:[%s3880_s9 + $0x70] sm:$0xff] }
 0x225   : > { %1515 = vmatpush.msrb.mxu1 %v2260_v1  ;;  %1535 = vmatpush.msrb.mxu3 %v2261_v2 }
 0x226   : > { %1593 = vmatpush.msrb.mxu0 %v1556_v38  ;;  %1649 = vmatpush.msra.mxu2 %v2293_v44  ;;  %v1809_v38 = vld [vmem:[%s3880_s9 + $0xd8] sm:$0xff]  ;;  %v1808_v44 = vld [vmem:[%s3880_s9 + $0xd0] sm:$0xff] }
 0x227   : > { %1516 = vmatpush.msrb.mxu1 %v2258_v3  ;;  %1536 = vmatpush.msrb.mxu3 %v2259_v4 }
 0x228   : > { %1594 = vmatpush.msrb.mxu0 %v1555_v33  ;;  %1650 = vmatpush.msra.mxu2 %v2292_v45  ;;  %v1773_v33 = vld [vmem:[%s3880_s9 + $0x78] sm:$0xff]  ;;  %v1807_v45 = vld [vmem:[%s3880_s9 + $0xc8] sm:$0xff] }
 0x229   : > { %1517 = vmatpush.msrb.mxu1 %v2256_v40  ;;  %1537 = vmatpush.msrb.mxu3 %v2257_v5 }
 0x22a   : > { %1651 = vmatpush.msra.mxu2 %v2291_v47  ;;  %v1736_v47 = vld [vmem:[%s3880_s9 + $0x18] sm:$0xff] }
 0x22b   : > { %1518 = vmatpush.msrb.mxu1 %v2254_v7  ;;  %1538 = vmatpush.msrb.mxu3 %v2255_v8  ;;  %v1548_v7 = vperm.slane %v1545_v58, 1  ;;  %v1803_v58 = vld [vmem:[%s3880_s9 + $0xa8] sm:$0xff] }
 0x22c   : > { %2284 = vmatmul.msk.f32.vlgmr.msrb.gmra.mxu1 %vm1226_vm7, %v1500_v10  ;;  %2285 = vmatmul.msk.f32.vlgmr.msrb.gmra.mxu3 %vm1226_vm7, %v1500_v10 }
 0x22d   : > { %1672 = vmatpush.msra.mxu1 %v2306_v43  ;;  %1652 = vmatpush.msra.mxu2 %v2290_v49  ;;  %v1771_v43 = vld [vmem:[%s3880_s9 + $0x68] sm:$0xff] }
 0x22e   : > { %v1839_v49 = vld [vmem:[%s3880_s9 + $0x108] sm:$0xff] }
 0x22f   : > { %1673 = vmatpush.msra.mxu1 %v2305_v39  ;;  %1653 = vmatpush.msra.mxu2 %v2289_v51  ;;  %v1737_v39 = vld [vmem:[%s3880_s9 + $0x20] sm:$0xff]  ;;  %v1805_v51 = vld [vmem:[%s3880_s9 + $0xb8] sm:$0xff] }
 0x231   : > { %1674 = vmatpush.msra.mxu1 %v2304_v46  ;;  %1654 = vmatpush.msra.mxu2 %v2288_v52  ;;  %v1840_v46 = vld [vmem:[%s3880_s9 + $0x110] sm:$0xff]  ;;  %v1770_v52 = vld [vmem:[%s3880_s9 + $0x60] sm:$0xff] }
 0x233   : > { %1675 = vmatpush.msra.mxu1 %v2303_v48  ;;  %1655 = vmatpush.msra.mxu2 %v2287_v53  ;;  %v1806_v48 = vld [vmem:[%s3880_s9 + $0xc0] sm:$0xff] }
 0x234   : > { %v1838_v53 = vld [vmem:[%s3880_s9 + $0x100] sm:$0xff] }
 0x235   : > { %1753 = vmatpush.msrb.mxu1 %v1742_v12 }
 0x237   : > { %1754 = vmatpush.msrb.mxu1 %v1741_v59  ;;  %v1876_v59 = vld [vmem:[%s3882_s11 + $0x20] sm:$0xff] }
 0x239   : > { %1755 = vmatpush.msrb.mxu1 %v1740_v15  ;;  %v1874_v15 = vld [vmem:[%s3882_s11 + $0x10] sm:$0xff] }
 0x23b   : > { %1756 = vmatpush.msrb.mxu1 %v1739_v17  ;;  %v1872_v17 = vld [vmem:[%s3882_s11] sm:$0xff] }
 0x23d   : > { %1757 = vmatpush.msrb.mxu1 %v1738_v19 }
 0x23f   : > { %1758 = vmatpush.msrb.mxu1 %v1737_v39 }
 0x241   : > { %1759 = vmatpush.msrb.mxu1 %v1736_v47 }
 0x280   : > { %v1288_v55 = vpop.f32.mrf.mxu0 }
 0x286   : > { %v1308_v57 = vpop.f32.mrf.mxu2 }
 0x28b   : > { %v1246_v50 = vpop.f32.mrf.mxu1 }
 0x28c   : > { %v1289_v56 = vadd.f32 %v1288_v55, %v1246_v50  ;;  %v1735_v50 = vld [vmem:[%s3880_s9 + $0x10] sm:$0xff] }
 0x28d   : > { %v1442_v60 = vpop.f32.mrf.mxu0  ;;  %1760 = vmatpush.msrb.mxu1 %v1735_v50  ;;  %v1804_v55 = vld [vmem:[%s3880_s9 + $0xb0] sm:$0xff] }
 0x291   : > { %v1266_v54 = vpop.f32.mrf.mxu3 }
 0x292   : > { %v1309_v62 = vadd.f32 %v1308_v57, %v1266_v54  ;;  %v1734_v54 = vld [vmem:[%s3880_s9 + $0x8] sm:$0xff]  ;;  %v1768_v57 = vld [vmem:[%s3880_s9 + $0x50] sm:$0xff] }
 0x293   : > { %v1364_v37 = vpop.f32.mrf.mxu1  ;;  %v1462_v40 = vpop.f32.mrf.mxu2  ;;  %1761 = vmatpush.msrb.mxu1 %v1734_v54 }
 0x294   : > { %v1387_v20 = vadd.f32 %v1364_v37, %v1289_v56  ;;  %v1769_v37 = vld [vmem:[%s3880_s9 + $0x58] sm:$0xff] }
 0x295   : > { %v1837_v56 = vld [vmem:[%s3880_s9 + $0xf8] sm:$0xff] }
 0x296   : > { %v1465_v63 = vadd.f32 %v1442_v60, %v1387_v20  ;;  %v1733_v20 = vld [vmem:[%s3880_s9] sm:$0xff]  ;;  %v1836_v60 = vld [vmem:[%s3880_s9 + $0xf0] sm:$0xff] }
 0x297   : > { %1762 = vmatpush.msrb.mxu1 %v1733_v20 }
 0x299   : > { %v1384_v61 = vpop.f32.mrf.mxu3 }
 0x29a   : > { %v1388_v2 = vadd.f32 %v1384_v61, %v1309_v62  ;;  %v1802_v61 = vld [vmem:[%s3880_s9 + $0xa0] sm:$0xff]  ;;  %v1887_v62 = vld [vmem:[%s3882_s11 + $0x78] sm:$0xff] }
 0x29c   : > { %v1466_v6 = vadd.f32 %v1462_v40, %v1388_v2  ;;  %v1883_v2 = vld [vmem:[%s3882_s11 + $0x58] sm:$0xff]  ;;  %v1880_v40 = vld [vmem:[%s3882_s11 + $0x40] sm:$0xff] }
 0x2a9   : > { %v1520_v1 = vpop.f32.mrf.mxu1 }
 0x2aa   : > { %v1543_v3 = vadd.f32 %v1520_v1, %v1465_v63  ;;  %v1886_v63 = vld [vmem:[%s3882_s11 + $0x70] sm:$0xff]  ;;  %v1884_v1 = vld [vmem:[%s3882_s11 + $0x60] sm:$0xff] }
 0x2ac   : > { %v1551_v4 = vadd.f32 %v1547_v0, %v1543_v3  ;;  %v1885_v0 = vld [vmem:[%s3882_s11 + $0x68] sm:$0xff]  ;;  %v1882_v3 = vld [vmem:[%s3882_s11 + $0x50] sm:$0xff] }
 0x2ae   : > { %v1553_v5 = vmax.f32 %v1551_v4, 0.0  ;;  %v1881_v4 = vld [vmem:[%s3882_s11 + $0x48] sm:$0xff] }
 0x2af   : > { %v1540_v8 = vpop.f32.mrf.mxu3 }
 0x2b0   : > { %v1544_v9 = vadd.f32 %v1540_v8, %v1466_v6  ;;  %1595 = vmatmul.f32.vlgmr.msrb.gmra.mxu0 %v1553_v5  ;;  %v1878_v6 = vld [vmem:[%s3882_s11 + $0x30] sm:$0xff] }
 0x2b2   : > { %v1552_v10 = vadd.f32 %v1548_v7, %v1544_v9 }
 0x2b4   : > { %v1554_v11 = vmax.f32 %v1552_v10, 0.0 }
 0x2b6   : > { %2286 = vmatmul.msk.f32.vlgmr.msrb.gmra.mxu2 %vm1575_vm8, %v1554_v11  ;;  %2307 = vmatmul.msk.f32.vlgmr.msra.gmra.mxu1 %vm1575_vm8, %v1554_v11 }
 0x2b7   : > { %1855 = vmatpush.msrb.mxu2 %v1845_v13  ;;  %1889 = vmatpush.msra.mxu1 %v1887_v62  ;;  %v1877_v13 = vld [vmem:[%s3882_s11 + $0x28] sm:$0xff] }
 0x2b9   : > { %1856 = vmatpush.msrb.mxu2 %v1844_v14  ;;  %1890 = vmatpush.msra.mxu1 %v1886_v63  ;;  %v1875_v14 = vld [vmem:[%s3882_s11 + $0x18] sm:$0xff] }
 0x2bb   : > { %1857 = vmatpush.msrb.mxu2 %v1843_v16  ;;  %1891 = vmatpush.msra.mxu1 %v1885_v0  ;;  %v1873_v16 = vld [vmem:[%s3882_s11 + $0x8] sm:$0xff] }
 0x2bd   : > { %1858 = vmatpush.msrb.mxu2 %v1842_v18  ;;  %1892 = vmatpush.msra.mxu1 %v1884_v1  ;;  %v1732_v18 = vld [vmem:[%s3881_s10] sm:$0x1] }
 0x2be   : > { %1656 = vmatmul.f32.vlgmr.msra.gmra.mxu2 %v1553_v5  ;;  %v1879_v5 = vld [vmem:[%s3882_s11 + $0x38] sm:$0xff] }
 0x2bf   : > { %1859 = vmatpush.msrb.mxu2 %v1841_v21  ;;  %1893 = vmatpush.msra.mxu1 %v1883_v2 }
 0x2c1   : > { %1860 = vmatpush.msrb.mxu2 %v1840_v46  ;;  %1894 = vmatpush.msra.mxu1 %v1882_v3 }
 0x2c3   : > { %1861 = vmatpush.msrb.mxu2 %v1839_v49  ;;  %1895 = vmatpush.msra.mxu1 %v1881_v4 }
 0x2c5   : > { %1862 = vmatpush.msrb.mxu2 %v1838_v53  ;;  %1896 = vmatpush.msra.mxu1 %v1880_v40 }
 0x2c7   : > { %1863 = vmatpush.msrb.mxu2 %v1837_v56  ;;  %1897 = vmatpush.msra.mxu1 %v1879_v5 }
 0x2c9   : > { %1864 = vmatpush.msrb.mxu2 %v1836_v60  ;;  %1898 = vmatpush.msra.mxu1 %v1878_v6 }
 0x2cb   : > { %1899 = vmatpush.msra.mxu1 %v1877_v13 }
 0x2cd   : > { %1900 = vmatpush.msra.mxu1 %v1876_v59 }
 0x2cf   : > { %1901 = vmatpush.msra.mxu1 %v1875_v14 }
 0x2d1   : > { %1902 = vmatpush.msra.mxu1 %v1874_v15 }
 0x2d3   : > { %1903 = vmatpush.msra.mxu1 %v1873_v16 }
 0x2d5   : > { %1904 = vmatpush.msra.mxu1 %v1872_v17 }
 0x32d   : > { %v1596_v23 = vpop.f32.mrf.mxu0 }
 0x333   : > { %v1677_v24 = vpop.f32.mrf.mxu1 }
 0x339   : > { %v1616_v22 = vpop.f32.mrf.mxu2 }
 0x33a   : > { %v1617_v26 = vadd.f32 %v1616_v22, %v1596_v23 }
 0x341   : > { %v1657_v25 = vpop.f32.mrf.mxu2 }
 0x342   : > { %v1678_v27 = vadd.f32 %v1677_v24, %v1657_v25 }
 0x344   : > { %v1680_v28 = vmax.f32 %v1617_v26, %v1678_v27 }
 0x346   : > { %1701 = vmatpush.msra.mxu3 %v1680_v28  ;;  %1726 = vmatpush.msra.mxu0 %v1680_v28 }
 0x347   : > { %2308 = vmatmul.msk.f32.vlgmr.msra.gmra.mxu3 %vm1682_vm9, %v1681_v29  ;;  %2310 = vmatmul.msk.f32.vlgmr.msra.gmra.mxu0 %vm1682_vm9, %v2309_v30  ;;  %v1888_v29 = vld [vmem:[%s3883_s12] sm:$0x1] }
 0x348   : > { %1787 = vmatpush.msrb.mxu3 %v1777_v31  ;;  %1821 = vmatpush.msrb.mxu0 %v1811_v32 }
 0x34a   : > { %1788 = vmatpush.msrb.mxu3 %v1776_v34  ;;  %1822 = vmatpush.msrb.mxu0 %v1810_v35 }
 0x34c   : > { %1789 = vmatpush.msrb.mxu3 %v1775_v36  ;;  %1823 = vmatpush.msrb.mxu0 %v1809_v38 }
 0x34e   : > { %1790 = vmatpush.msrb.mxu3 %v1774_v41  ;;  %1824 = vmatpush.msrb.mxu0 %v1808_v44 }
 0x350   : > { %1791 = vmatpush.msrb.mxu3 %v1773_v33  ;;  %1825 = vmatpush.msrb.mxu0 %v1807_v45 }
 0x352   : > { %1792 = vmatpush.msrb.mxu3 %v1772_v42  ;;  %1826 = vmatpush.msrb.mxu0 %v1806_v48 }
 0x354   : > { %1793 = vmatpush.msrb.mxu3 %v1771_v43  ;;  %1827 = vmatpush.msrb.mxu0 %v1805_v51 }
 0x356   : > { %1794 = vmatpush.msrb.mxu3 %v1770_v52  ;;  %1828 = vmatpush.msrb.mxu0 %v1804_v55 }
 0x358   : > { %1795 = vmatpush.msrb.mxu3 %v1769_v37  ;;  %1829 = vmatpush.msrb.mxu0 %v1803_v58 }
 0x35a   : > { %1796 = vmatpush.msrb.mxu3 %v1768_v57  ;;  %1830 = vmatpush.msrb.mxu0 %v1802_v61 }
 0x3c4   : > { %v1728_v7 = vpop.f32.mrf.mxu0 }
 0x3ca   : > { %v1703_v8 = vpop.f32.mrf.mxu3 }
 0x3cb   : > { %v1731_v9 = vmax.f32 %v1703_v8, %v1728_v7 }
 0x3cd   : > { %v1778_v10 = vrot.slane %v1731_v9, 1  ;;  %v1812_v11 = vrot.slane %v1731_v9, 2  ;;  %v1846_v12 = vrot.slane %v1731_v9, 3  ;;  %2311 = vmatmul.msk.f32.vlgmr.msrb.gmra.mxu1 %vm1743_vm10, %v1731_v9 }
 0x3cf   : > { %2312 = vmatmul.msk.f32.vlgmr.msrb.gmra.mxu3 %vm1743_vm10, %v1778_v10  ;;  %2314 = vmatmul.msk.f32.vlgmr.msrb.gmra.mxu2 %vm1743_vm10, %v1846_v12 }
 0x3d0   : > { %2313 = vmatmul.msk.f32.vlgmr.msrb.gmra.mxu0 %vm1743_vm10, %v1812_v11 }
 0x44a   : > { %v1764_v19 = vpop.f32.mrf.mxu1 }
 0x44b   : > { %v1767_v21 = vadd.f32 %v1764_v19, %v1732_v18 }
 0x44d   : > { %v1832_v24 = vpop.f32.mrf.mxu0 }
 0x452   : > { %v1798_v22 = vpop.f32.mrf.mxu3  ;;  %v1866_v26 = vpop.f32.mrf.mxu2 }
 0x453   : > { %v1801_v23 = vadd.f32 %v1798_v22, %v1767_v21 }
 0x455   : > { %v1835_v25 = vadd.f32 %v1832_v24, %v1801_v23 }
 0x457   : > { %v1869_v27 = vadd.f32 %v1866_v26, %v1835_v25 }
 0x459   : > { %v1870_v28 = vmax.f32 %v1869_v27, 0.0 }
 0x45b   : > { %1871 = vst [vmem:[%s463_s19] sm:$0x1] %v1870_v28  ;;  %1905 = vmatmul.f32.vlgmr.msra.gmra.mxu1 %v1870_v28 }
 0x4d8   : > { %v1906_v30 = vpop.f32.mrf.mxu1 }
 0x4d9   : > { %v1907_v31 = vadd.f32 %v1906_v30, %v1888_v29 }
 0x4db   : > { %v1910_v32 = vsel %vm1909_vm11, %v1907_v31, -inf }
 0x4dc   : > { %1911 = vmax.xlane.f32.xlu0 %v1910_v32 }
 0x54f   : > { %v1912_v34 = vpop.xlane.xlu0 %1911 }
 0x550   : > { %v1913_v35 = vsub.f32 %v1907_v31, %v1912_v34 }
 0x552   : > { %v1914_v36 = vmul.f32 1.442695, %v1913_v35 }
 0x554   : > { %2370 = vpow2.f32 %v1914_v36 }
 0x55a   : > { %v2371_v38 = vpop.eup %2370 }
 0x55b   : > { %v1916_v41 = vsel %vm1909_vm11, %v2371_v38, 0.0 }
 0x55c   : > { %1917 = vadd.xlane.f32.xlu0 %v1916_v41 }
 0x55d   : > { %2401 = shalt.err (!%p2398_p3)
}
 0x55e   : > { %2326 = dma.vmem_to_hbm [thread:$0]  (%p2583_p5), %s1939_s22, 16, %s1941_s21, %s1924_s18  }
 0x55f   : > { %s1949_s24 = scalar_lea.hbm %s3885_s14, %s2566_s17  ;;  %s469_s0 = scalar_lea.vmem [#allocation4], %s3817_s29 }
 0x560   : > { %s1951_s26 = sshll.u32 %s469_s0, 4  ;;  %s1953_s27 = sshll.u32 %s1949_s24, 4  ;;  %s1952_s26 = int_to_ptr.vmem [resolvable:$true] %s1951_s26  ;;  %s1954_s27 = int_to_ptr.hbm [resolvable:$true] %s1953_s27 }
 0x561   : > { %s1928_s25 = scalar_lea.sflag [#allocation5], %s3817_s29  ;;  %s2416_s28 = sshra.s32 %s1954_s27, 4  ;;  %s2417_s28 = int_to_ptr.hbm [resolvable:$true] %s2416_s28 }
 0x562   : > { %s2418_s22 = scalar_lea.hbm %s2417_s28, 1  ;;  %s2422_s17 = scalar_lea.hbm %s3885_s14, 2 }
 0x563   : > { %p2419_p4 = scmp.ne.s32.totalorder %s2417_s28, %s2418_s22  ;;  %p2423_p9 = scmp.lt.s32.totalorder %s2417_s28, %s3885_s14 }
 0x564   : > { %p2424_p10 = scmp.lt.s32.totalorder %s2422_s17, %s2418_s22 }
 0x565   : > { %p2420_p7 = pnand %p2419_p4, %p2583_p5 }
 0x566   : > { %p2425_p11 = por %p2424_p10, %p2423_p9 }
 0x567   : > { %p2421_p8 = pneg %p2420_p7 }
 0x569   : > { %p2426_p12 = pnand %p2425_p11, %p2421_p8 }
 0x5cf   : > { %v1918_v33 = vpop.xlane.xlu0 %1917 }
 0x5d0   : > { %2372 = vlog2.f32 %v1918_v33 }
 0x5d6   : > { %v2373_v42 = vpop.eup %2372 }
 0x5d7   : > { %v1920_v43 = vmul.f32 0.6931472, %v2373_v42 }
 0x5d9   : > { %v1921_v44 = vsub.f32 %v1913_v35, %v1920_v43 }
 0x5db   : > { %1922 = vst [vmem:[%s469_s0] sm:$0x1] %v1921_v44 }
 0x5dc   : > { %2429 = shalt.err (!%p2426_p12)
}
 0x5dd   : > { %2327 = dma.vmem_to_hbm [thread:$0]  (%p2583_p5), %s1952_s26, 16, %s1954_s27, %s1928_s25  }
 0x5de PF: > { %s3900_s29 = sld [smem:[#allocation8_spill]]  ;;  %p2337_p13 = scmp.ge.s32.totalorder %s2468_s16, 2 }
 0x5e0   : > { %p2331_p0 = pnand %p2337_p13, %p2587_p6 }
 0x5e2   : > { %p2332_p1 = pneg %p2331_p0 }
 0x5e4   : > { %s1965_s24 = sand.u32 1, %s3900_s29  }
 0x5e5   : > { %s1966_s0 = scalar_lea.sflag [#allocation3], %s1965_s24 }
 0x5e6   : > { %2447 = dma.done.wait (%p2332_p1), %s1966_s0, 16  }
 0x5e7   : > { %2449 = vsyncadd (%p2332_p1), %s1966_s0, 4294967280  ;;  %s1975_s28 = scalar_lea.sflag [#allocation5], %s1965_s24 }
 0x5e8   : > { %2451 = dma.done.wait (%p2332_p1), %s1975_s28, 16  }
 0x5e9   : > { %2453 = vsyncadd (%p2332_p1), %s1975_s28, 4294967280  ;;  %s3902_s16 = sld [smem:[#allocation10_spill]]  ;;  %s3905_s29 = smov %s2460_s30 }
 0x5ea   : > { %s3903_s22 = sld [smem:[#allocation9_spill]] }
 0x5eb   : > { %s3904_s15 = sld [smem:[#allocation11_spill]] }
 0x5ef   : > { %p28_p5 = scmp.ge.s32.totalorder %s3902_s16, 4  }
 0x5f0   : > { %s3906_s30 = smov %s3903_s22 }
 0x5f1   :  { %30 = sbr.rel (!%p28_p5) target bundleno = 7 (0x7), region = 136 }
 0x5f6   :  { %1980 = vsyncpa [#allocation3], 1 }
 0x5f7   :  { %1982 = vsyncpa [#allocation3 + $0x1], 1 }
 0x5f8   :  { %1983 = vsyncpa [#allocation5], 1 }
 0x5f9   :  { %1985 = vsyncpa [#allocation5 + $0x1], 1 }

</bundles_post_ra>
